<compile_context>
chip_gen: v6e
topology: v6e:2x2x1
jax: 0.10.0
libtpu: 0.0.40
codegen_flags: <defaults>
</compile_context>

<pallas_src>
import functools
import math

import numpy as np
import jax
import jax.numpy as jnp
from jax.experimental import pallas as pl
from jax.experimental.pallas import tpu as pltpu

ROW_ALIGN = 1024                    # per-point tensors padded once to this multiple
_VMEM_LIMIT = 48 * 1024 * 1024      # leaves headroom inside v7x's 64 MiB VMEM


def _round_up(x, m):
    return ((x + m - 1) // m) * m


def _cparams(grid_len, seq_last=False, vmem=None):
    sem = ["parallel"] * grid_len
    if seq_last and grid_len:
        sem[-1] = "arbitrary"
    kw = {"dimension_semantics": tuple(sem)}
    if vmem is not None:
        kw["vmem_limit_bytes"] = vmem
    return pltpu.CompilerParams(**kw)


# ----------------------------------------------------------------------------
# Pallas kernels
# ----------------------------------------------------------------------------

def _mlp_kernel(*refs, n_layers, relus):
    """Fused chain of Linear(+ReLU) layers; refs = (x, w1, b1, ..., wn, bn, out)."""
    x_ref = refs[0]
    o_ref = refs[-1]
    h = x_ref[...]
    for l in range(n_layers):
        w = refs[1 + 2 * l][...]          # bf16
        b = refs[2 + 2 * l][...]          # f32 (1, N)
        h = jnp.dot(h.astype(jnp.bfloat16), w,
                    preferred_element_type=jnp.float32) + b
        if relus[l]:
            h = jnp.maximum(h, 0.0)
    o_ref[...] = h


def pallas_mlp(x, layers, relus, tm=512, vmem=None):
    """y = fused chain of (x @ w + b [; relu]); BN already folded into (w, b)."""
    x = x.astype(jnp.float32)
    M, K = x.shape
    tm = int(min(tm, _round_up(M, 8)))
    Mp = _round_up(M, tm)
    if Mp != M:
        x = jnp.pad(x, ((0, Mp - M), (0, 0)))
    n_out = layers[-1][0].shape[1]
    in_specs = [pl.BlockSpec((tm, K), lambda i: (i, 0))]
    args = [x]
    for (w, b) in layers:
        kin, nout = w.shape
        in_specs.append(pl.BlockSpec((kin, nout), lambda i: (0, 0)))
        in_specs.append(pl.BlockSpec((1, nout), lambda i: (0, 0)))
        args.append(w.astype(jnp.bfloat16))
        args.append(b.reshape(1, nout).astype(jnp.float32))
    out = pl.pallas_call(
        functools.partial(_mlp_kernel, n_layers=len(layers), relus=tuple(relus)),
        out_shape=jax.ShapeDtypeStruct((Mp, n_out), jnp.float32),
        grid=(Mp // tm,),
        in_specs=in_specs,
        out_specs=pl.BlockSpec((tm, n_out), lambda i: (i, 0)),
        compiler_params=_cparams(1, vmem=vmem),
    )(*args)
    return out[:M] if Mp != M else out


def _linear_add_kernel(x_ref, w_ref, b_ref, a_ref, o_ref):
    o_ref[...] = (a_ref[...] + b_ref[...] +
                  jnp.dot(x_ref[...].astype(jnp.bfloat16), w_ref[...],
                          preferred_element_type=jnp.float32))


def pallas_linear_add(x, w, b, res, tm=1024):
    """out = res + x @ w + b   (PE projection fused with the residual add)."""
    M, K = x.shape
    N = w.shape[1]
    tm = int(min(tm, M))
    return pl.pallas_call(
        _linear_add_kernel,
        out_shape=jax.ShapeDtypeStruct((M, N), jnp.float32),
        grid=(M // tm,),
        in_specs=[
            pl.BlockSpec((tm, K), lambda i: (i, 0)),
            pl.BlockSpec((K, N), lambda i: (0, 0)),
            pl.BlockSpec((1, N), lambda i: (0, 0)),
            pl.BlockSpec((tm, N), lambda i: (i, 0)),
        ],
        out_specs=pl.BlockSpec((tm, N), lambda i: (i, 0)),
        compiler_params=_cparams(1),
    )(x.astype(jnp.float32), w.astype(jnp.bfloat16),
      b.reshape(1, N).astype(jnp.float32), res.astype(jnp.float32))


def _pe_feat_kernel(pe_ref, coef_ref, phase_ref, o_ref):
    coef = coef_ref[...]          # (1, 64)
    phase = phase_ref[...]        # (1, 64)  0 on even cols, pi/2 on odd (cos = shifted sin)
    y = pe_ref[:, 0:1]
    x = pe_ref[:, 1:2]
    o_ref[...] = jnp.concatenate(
        [jnp.sin(y * coef + phase), jnp.sin(x * coef + phase)], axis=1)


def pallas_pe_features(pe_raw, tm=1024):
    """Fourier positional features (N, 128); computed once, reused by pe0..pe3."""
    hidden = 64
    dim_t = 10000.0 ** (2 * (np.arange(hidden) // 2) / hidden)
    coef = jnp.asarray((2.0 * math.pi / (1.0 + 1e-6)) / dim_t,
                       dtype=jnp.float32).reshape(1, hidden)
    phase = jnp.asarray((np.arange(hidden) % 2) * (math.pi / 2.0),
                        dtype=jnp.float32).reshape(1, hidden)
    M = pe_raw.shape[0]
    tm = int(min(tm, M))
    return pl.pallas_call(
        _pe_feat_kernel,
        out_shape=jax.ShapeDtypeStruct((M, 2 * hidden), jnp.float32),
        grid=(M // tm,),
        in_specs=[
            pl.BlockSpec((tm, 2), lambda i: (i, 0)),
            pl.BlockSpec((1, hidden), lambda i: (0, 0)),
            pl.BlockSpec((1, hidden), lambda i: (0, 0)),
        ],
        out_specs=pl.BlockSpec((tm, 2 * hidden), lambda i: (i, 0)),
        compiler_params=_cparams(1),
    )(pe_raw.astype(jnp.float32), coef, phase)


def _premlp_kernel(x_ref, w1_ref, b1_ref, w2_ref, b2_ref, w3_ref, b3_ref,
                   wsc_ref, bsc_ref, ox_ref, os_ref):
    h = x_ref[...]
    h = jnp.maximum(jnp.dot(h.astype(jnp.bfloat16), w1_ref[...],
                            preferred_element_type=jnp.float32) + b1_ref[...], 0.0)
    h = jnp.maximum(jnp.dot(h.astype(jnp.bfloat16), w2_ref[...],
                            preferred_element_type=jnp.float32) + b2_ref[...], 0.0)
    hb = h.astype(jnp.bfloat16)
    ox_ref[...] = jnp.dot(hb, w3_ref[...], preferred_element_type=jnp.float32) + b3_ref[...]
    os_ref[...] = jnp.dot(hb, wsc_ref[...], preferred_element_type=jnp.float32) + bsc_ref[...]


def pallas_premlp_score(x, w1, b1, w2, b2, w3, b3, wsc, bsc):
    """Fused pre_mlp (3x Linear+BN[+ReLU]) + score head. Returns (x3, score)."""
    M, dim = x.shape
    k = wsc.shape[1]
    tm = 512 if dim >= 128 else 1024
    tm = int(min(tm, M))
    f32, bf = jnp.float32, jnp.bfloat16
    return pl.pallas_call(
        _premlp_kernel,
        out_shape=(jax.ShapeDtypeStruct((M, dim), f32),
                   jax.ShapeDtypeStruct((M, k), f32)),
        grid=(M // tm,),
        in_specs=[
            pl.BlockSpec((tm, dim), lambda i: (i, 0)),
            pl.BlockSpec((dim, dim), lambda i: (0, 0)),
            pl.BlockSpec((1, dim), lambda i: (0, 0)),
            pl.BlockSpec((dim, dim), lambda i: (0, 0)),
            pl.BlockSpec((1, dim), lambda i: (0, 0)),
            pl.BlockSpec((dim, dim), lambda i: (0, 0)),
            pl.BlockSpec((1, dim), lambda i: (0, 0)),
            pl.BlockSpec((dim, k), lambda i: (0, 0)),
            pl.BlockSpec((1, k), lambda i: (0, 0)),
        ],
        out_specs=(pl.BlockSpec((tm, dim), lambda i: (i, 0)),
                   pl.BlockSpec((tm, k), lambda i: (i, 0))),
        compiler_params=_cparams(1),
    )(x.astype(f32), w1.astype(bf), b1.reshape(1, dim).astype(f32),
      w2.astype(bf), b2.reshape(1, dim).astype(f32),
      w3.astype(bf), b3.reshape(1, dim).astype(f32),
      wsc.astype(bf), bsc.reshape(1, k).astype(f32))


def _attn_outer_kernel(e_ref, z_ref, x_ref, o_ref, *, k, dim):
    attn = e_ref[...] / z_ref[...]              # normalized scatter-softmax weights
    x = x_ref[...]
    o_ref[...] = jnp.concatenate([attn[:, j:j + 1] * x for j in range(k)], axis=1)


def pallas_attn_outer(e, z, x, k, dim):
    """(exp-scores / gathered segment-sum) outer-product x -> (N, k*dim), lane-dense."""
    M = x.shape[0]
    tm = 256 if dim * k >= 1024 else 512
    tm = int(min(tm, M))
    return pl.pallas_call(
        functools.partial(_attn_outer_kernel, k=k, dim=dim),
        out_shape=jax.ShapeDtypeStruct((M, k * dim), jnp.float32),
        grid=(M // tm,),
        in_specs=[
            pl.BlockSpec((tm, k), lambda i: (i, 0)),
            pl.BlockSpec((tm, k), lambda i: (i, 0)),
            pl.BlockSpec((tm, dim), lambda i: (i, 0)),
        ],
        out_specs=pl.BlockSpec((tm, k * dim), lambda i: (i, 0)),
        compiler_params=_cparams(1),
    )(e.astype(jnp.float32), z.astype(jnp.float32), x.astype(jnp.float32))


def _mhsa_kernel(inp_ref, x_ref, hp_ref, wq_ref, bq_ref, wk_ref, bk_ref,
                 wv_ref, bv_ref, wo_ref, bo_ref, g_ref, gt_ref, o_ref,
                 *, k, dim, scale):
    """Fused q/k/v projections + MHA (1 query, k latents, head size 4) + out-proj
    + concat([inp, attn_out]). k/v never leave VMEM."""
    xb = x_ref[...].astype(jnp.bfloat16)
    q = jnp.dot(xb, wq_ref[...], preferred_element_type=jnp.float32) + bq_ref[...]
    hp = hp_ref[...]
    g = g_ref[...]                       # (dim, H) 0/1 head-group indicator, bf16
    wk = wk_ref[...]
    bk = bk_ref[...]
    wv = wv_ref[...]
    bv = bv_ref[...]
    logits, values = [], []
    for j in range(k):
        hj = hp[:, j * dim:(j + 1) * dim].astype(jnp.bfloat16)
        kj = jnp.dot(hj, wk, preferred_element_type=jnp.float32) + bk
        vj = jnp.dot(hj, wv, preferred_element_type=jnp.float32) + bv
        lj = jnp.dot((q * kj).astype(jnp.bfloat16), g,
                     preferred_element_type=jnp.float32) * scale   # (tm, H)
        logits.append(lj)
        values.append(vj)
    m = logits[0]
    for j in range(1, k):
        m = jnp.maximum(m, logits[j])
    es = [jnp.exp(l - m) for l in logits]
    z = es[0]
    for j in range(1, k):
        z = z + es[j]
    inv_z = 1.0 / z
    gt = gt_ref[...]                     # (H, dim) f32
    acc = jnp.zeros_like(q)
    for j in range(k):
        pj = jnp.dot(es[j] * inv_z, gt, preferred_element_type=jnp.float32)  # (tm, dim)
        acc = acc + pj * values[j]
    out = jnp.dot(acc.astype(jnp.bfloat16), wo_ref[...],
                  preferred_element_type=jnp.float32) + bo_ref[...]
    o_ref[...] = jnp.concatenate([inp_ref[...], out], axis=1)


def pallas_mhsa_block(inp, x, hp, wq, bq, wk, bk, wv, bv, wo, bo, k, dim):
    M = x.shape[0]
    Hh = dim // 4                        # num_heads = dim // 4  =>  head_dim = 4
    scale = 1.0 / math.sqrt(4.0)
    g = (jnp.arange(dim)[:, None] // 4 == jnp.arange(Hh)[None, :])
    g_bf = g.astype(jnp.bfloat16)
    gt_f = g.T.astype(jnp.float32)
    tm = 256 if dim >= 128 else 512
    tm = int(min(tm, M))
    f32, bf = jnp.float32, jnp.bfloat16
    return pl.pallas_call(
        functools.partial(_mhsa_kernel, k=k, dim=dim, scale=scale),
        out_shape=jax.ShapeDtypeStruct((M, 2 * dim), f32),
        grid=(M // tm,),
        in_specs=[
            pl.BlockSpec((tm, dim), lambda i: (i, 0)),        # inp (for the final concat)
            pl.BlockSpec((tm, dim), lambda i: (i, 0)),        # x  -> queries
            pl.BlockSpec((tm, k * dim), lambda i: (i, 0)),    # hp -> keys / values
            pl.BlockSpec((dim, dim), lambda i: (0, 0)),       # wq
            pl.BlockSpec((1, dim), lambda i: (0, 0)),
            pl.BlockSpec((dim, dim), lambda i: (0, 0)),       # wk (BN folded)
            pl.BlockSpec((1, dim), lambda i: (0, 0)),
            pl.BlockSpec((dim, dim), lambda i: (0, 0)),       # wv (BN folded)
            pl.BlockSpec((1, dim), lambda i: (0, 0)),
            pl.BlockSpec((dim, dim), lambda i: (0, 0)),       # wo
            pl.BlockSpec((1, dim), lambda i: (0, 0)),
            pl.BlockSpec((dim, Hh), lambda i: (0, 0)),        # head indicator
            pl.BlockSpec((Hh, dim), lambda i: (0, 0)),        # its transpose
        ],
        out_specs=pl.BlockSpec((tm, 2 * dim), lambda i: (i, 0)),
        compiler_params=_cparams(1, vmem=_VMEM_LIMIT),
    )(inp.astype(f32), x.astype(f32), hp.astype(f32),
      wq.astype(bf), bq.reshape(1, dim).astype(f32),
      wk.astype(bf), bk.reshape(1, dim).astype(f32),
      wv.astype(bf), bv.reshape(1, dim).astype(f32),
      wo.astype(bf), bo.reshape(1, dim).astype(f32),
      g_bf, gt_f)


def _dwconv_kernel(xlo_ref, xhi_ref, w_ref, s_ref, t_ref, o_ref, *, th, W, relu):
    # xlo/xhi: consecutive (1, th, W+2, tc) row blocks of the padded canvas;
    # the 2-row halo comes from the first two rows of the next block.
    lo = xlo_ref[0, :, :, :]                      # (th,  W+2, tc)
    hi = xhi_ref[0, 0:2, :, :]                    # (2,   W+2, tc)
    x = jnp.concatenate([lo, hi], axis=0)         # (th+2, W+2, tc)
    w = w_ref[...]                                # (9, tc)
    cols = []
    for kx in range(3):                           # accumulate ky taps at full padded width
        acc = None
        for ky in range(3):
            kidx = ky * 3 + kx
            tap = x[ky:ky + th] * w[kidx:kidx + 1][None]      # (th, W+2, tc)
            acc = tap if acc is None else acc + tap
        cols.append(acc)
    # only 3 shifted slices (instead of 9) to realize the +/-1 column taps
    y = cols[0][:, 0:W, :] + cols[1][:, 1:W + 1, :] + cols[2][:, 2:W + 2, :]
    y = y * s_ref[...][None] + t_ref[...][None]   # folded BatchNorm2d
    if relu:
        y = jnp.maximum(y, 0.0)
    o_ref[0, :, :, :] = y


def _dwconv_tiles(H, C):
    tc = 128 if C % 128 == 0 else C
    th = min(H, 16)
    while H % th:
        th -= 1
    return th, tc


def _pad_canvas(x, th):
    # 1 row/col of conv padding (+ th-1 extra zero rows so the halo block stays in range)
    return jnp.pad(x, ((0, 0), (1, th - 1), (1, 1), (0, 0)))


def pallas_dwconv3x3(canvas, w9c, scale, shift, H, W, th, tc, relu=True):
    """Depthwise 3x3 conv (padding=1) + folded BN + optional ReLU on an NHWC canvas.

    canvas: (B, H + th, W + 2, C) zero canvas with the image at rows [1, 1+H), cols [1, 1+W).
    Returns (B, H, W, C) float32.
    """
    B = canvas.shape[0]
    C = canvas.shape[3]
    NR = H // th
    NC = C // tc
    canvas = canvas.astype(jnp.float32)
    return pl.pallas_call(
        functools.partial(_dwconv_kernel, th=th, W=W, relu=relu),
        out_shape=jax.ShapeDtypeStruct((B, H, W, C), jnp.float32),
        grid=(B, NC, NR),
        in_specs=[
            pl.BlockSpec((1, th, W + 2, tc), lambda b, c, r: (b, r, 0, c)),
            pl.BlockSpec((1, th, W + 2, tc), lambda b, c, r: (b, r + 1, 0, c)),
            pl.BlockSpec((9, tc), lambda b, c, r: (0, c)),
            pl.BlockSpec((1, tc), lambda b, c, r: (0, c)),
            pl.BlockSpec((1, tc), lambda b, c, r: (0, c)),
        ],
        out_specs=pl.BlockSpec((1, th, W, tc), lambda b, c, r: (b, r, 0, c)),
        compiler_params=_cparams(3, seq_last=True, vmem=_VMEM_LIMIT),
    )(canvas, canvas, w9c.astype(jnp.float32),
      scale.reshape(1, C).astype(jnp.float32),
      shift.reshape(1, C).astype(jnp.float32))


# ----------------------------------------------------------------------------
# Plain-JAX glue (data-dependent scatter / gather / segment ops)
# ----------------------------------------------------------------------------

def bn_fold(bn, eps):
    s = bn['gamma'] / jnp.sqrt(bn['var'] + eps)
    t = bn['beta'] - bn['mean'] * s
    return s, t


def linear_bn_fold(w, b, bn, eps):
    s, t = bn_fold(bn, eps)
    return w * s[None, :], b * s + t


# ----------------------------------------------------------------------------
# Parameter init (deterministic, synthetic)
# ----------------------------------------------------------------------------

def _init_linear(key, fan_in, fan_out, scale=0.1):
    k1, k2 = jax.random.split(key)
    return {'w': scale * jax.random.normal(k1, (fan_in, fan_out), jnp.float32),
            'b': scale * jax.random.normal(k2, (fan_out,), jnp.float32)}


def _init_bn(key, c):
    k1, k2, k3, k4 = jax.random.split(key, 4)
    return {'gamma': 1.0 + 0.1 * jax.random.normal(k1, (c,), jnp.float32),
            'beta': 0.1 * jax.random.normal(k2, (c,), jnp.float32),
            'mean': 0.1 * jax.random.normal(k3, (c,), jnp.float32),
            'var': 1.0 + 0.1 * jax.random.uniform(k4, (c,), jnp.float32)}


def _init_vsa(key, dim, k_lat):
    keys = jax.random.split(key, 20)
    conv_dim = dim * k_lat
    p = {}
    p['pre'] = [(_init_linear(keys[2 * i], dim, dim), _init_bn(keys[2 * i + 1], dim))
                for i in range(3)]
    p['score'] = _init_linear(keys[6], dim, k_lat)
    p['dw1'] = 0.1 * jax.random.normal(keys[7], (9, conv_dim), jnp.float32)
    p['bn_dw1'] = _init_bn(keys[8], conv_dim)
    p['dw2'] = 0.1 * jax.random.normal(keys[9], (9, conv_dim), jnp.float32)
    p['bn_dw2'] = _init_bn(keys[10], conv_dim)
    p['conv1x1'] = 0.1 * jax.random.normal(keys[11], (conv_dim, conv_dim), jnp.float32)
    p['norm'] = _init_bn(keys[12], dim)
    p['wq'] = _init_linear(keys[13], dim, dim)
    p['wk'] = _init_linear(keys[14], dim, dim)
    p['wv'] = _init_linear(keys[15], dim, dim)
    p['wo'] = _init_linear(keys[16], dim, dim)
    return p


def build_params(key):
    keys = jax.random.split(key, 16)
    params = {
        'embed0': _init_linear(keys[0], 9, 16),
        'embed1': _init_linear(keys[1], 16, 16),
        'pe0': _init_linear(keys[2], 128, 16),
        'pe1': _init_linear(keys[3], 128, 32),
        'pe2': _init_linear(keys[4], 128, 64),
        'pe3': _init_linear(keys[5], 128, 128),
        'vsa0': _init_vsa(keys[6], 16, 8),
        'vsa1': _init_vsa(keys[7], 32, 8),
        'vsa2': _init_vsa(keys[8], 64, 8),
        'vsa3': _init_vsa(keys[9], 128, 8),
    }
    post = []
    for i, (a, b) in enumerate([(256, 64), (64, 64), (64, 64)]):
        post.append((_init_linear(keys[10 + i], a, b), _init_bn(keys[13 + i], b)))
    params['post'] = post
    return params


# ----------------------------------------------------------------------------
# Model forward
# ----------------------------------------------------------------------------

def mlp_vsa_layer(p, inp, inverse, coords_int, bev_shape, dim, k_lat, batch_size):
    eps1d, eps2d = 1e-3, 1e-5    # BatchNorm1d(eps=0.001) / BatchNorm2d(default 1e-5)

    # ---- fused pre_mlp + score head (score folded onto the 3rd matmul) ----
    (l1, bn1), (l2, bn2), (l3, bn3) = p['pre']
    w1, b1 = linear_bn_fold(l1['w'], l1['b'], bn1, eps1d)
    w2, b2 = linear_bn_fold(l2['w'], l2['b'], bn2, eps1d)
    w3, b3 = linear_bn_fold(l3['w'], l3['b'], bn3, eps1d)
    wsc = w3 @ p['score']['w']
    bsc = b3 @ p['score']['w'] + p['score']['b']
    x, score = pallas_premlp_score(inp, w1, b1, w2, b2, w3, b3, wsc, bsc)

    n_vox = int(coords_int.shape[0])

    # ---- scatter softmax over the points of each voxel ----
    # TODO(synk): segment max/sum are data-dependent (torch_scatter) -> XLA segment ops.
    seg_max = jax.ops.segment_max(score, inverse, num_segments=n_vox)
    e = jnp.exp(score - seg_max[inverse])
    seg_sum = jax.ops.segment_sum(e, inverse, num_segments=n_vox)
    dot = pallas_attn_outer(e, seg_sum[inverse], x, k_lat, dim)          # (Np, dim*k)
    x_ = jnp.maximum(jax.ops.segment_sum(dot, inverse, num_segments=n_vox), 0.0)

    # ---- densify into a zero-padded BEV canvas (no separate pad copy) ----
    H, W = bev_shape
    conv_dim = dim * k_lat
    th, tc = _dwconv_tiles(H, conv_dim)
    canvas = jnp.zeros((batch_size, H + th, W + 2, conv_dim), jnp.float32)
    canvas = canvas.at[coords_int[:, 0], coords_int[:, 1] + 1,
                       coords_int[:, 2] + 1, :].set(x_)

    s1, t1 = bn_fold(p['bn_dw1'], eps2d)
    s2, t2 = bn_fold(p['bn_dw2'], eps2d)
    h = pallas_dwconv3x3(canvas, p['dw1'], s1, t1, H, W, th, tc, relu=True)
    # TODO(synk): re-pad between the two depthwise convs is one extra HBM copy.
    h = pallas_dwconv3x3(_pad_canvas(h, th), p['dw2'], s2, t2, H, W, th, tc, relu=True)
    # 1x1 conv == channel matmul over the flattened dense map
    h = pallas_mlp(h.reshape(-1, conv_dim),
                   [(p['conv1x1'], jnp.zeros((conv_dim,), jnp.float32))],
                   [False], tm=512, vmem=_VMEM_LIMIT)

    # gather voxel features back to points (data-dependent -> XLA gather)
    flat_idx = coords_int[:, 0] * (H * W) + coords_int[:, 1] * W + coords_int[:, 2]
    hp = h[flat_idx][inverse]                                            # (Np, conv_dim)

    # BatchNorm1d(dim) folded into the k/v projections
    sN, tN = bn_fold(p['norm'], eps1d)
    wk_f = sN[:, None] * p['wk']['w']
    bk_f = tN @ p['wk']['w'] + p['wk']['b']
    wv_f = sN[:, None] * p['wv']['w']
    bv_f = tN @ p['wv']['w'] + p['wv']['b']

    # fused q/k/v + MHSA + out-proj + concat([inp, out]); k/v never hit HBM
    return pallas_mhsa_block(inp, x, hp,
                             p['wq']['w'], p['wq']['b'], wk_f, bk_f,
                             wv_f, bv_f, p['wo']['w'], p['wo']['b'], k_lat, dim)


def voxset_forward(params, points, grid_size):
    points = jnp.asarray(points, jnp.float32)
    pts_np = np.asarray(points)
    n_real = points.shape[0]
    batch_size = int(pts_np[:, 0].max()) + 1

    # Pad the point dimension ONCE; all per-point kernels run on Np rows with no
    # per-call pad/slice copies.  Padded rows carry an out-of-range segment id and
    # are dropped by every segment op.
    n_pad = _round_up(n_real, ROW_ALIGN)
    points_p = jnp.pad(points, ((0, n_pad - n_real), (0, 0)))

    def voxelize(vs):
        coords = pts_np[:, :3].copy()
        coords[:, 1:3] = np.floor((pts_np[:, 1:3] - 1e-5) / vs)
        uniq, inverse = np.unique(coords, axis=0, return_inverse=True)
        inv_p = np.full((n_pad,), uniq.shape[0], np.int32)
        inv_p[:n_real] = inverse.reshape(-1).astype(np.int32)
        return jnp.asarray(uniq.astype(np.int32)), jnp.asarray(inv_p)

    # TODO(synk): torch.unique / torch_scatter have no clean Pallas equivalent
    # (data-dependent sizes); voxel bookkeeping stays on the host / in XLA.
    c1, inv1 = voxelize(1.0)
    c2, inv2 = voxelize(2.0)
    c4, inv4 = voxelize(4.0)
    c8, inv8 = voxelize(8.0)

    # input_embed: MLP(9 -> 16 -> 16), fused into one kernel
    src = pallas_mlp(points_p[:, 1:],
                     [(params['embed0']['w'], params['embed0']['b']),
                      (params['embed1']['w'], params['embed1']['b'])],
                     [True, False], tm=1024)

    # Fourier positional features computed once and shared by pe0..pe3
    pos = pallas_pe_features(points_p[:, 1:3])

    g = grid_size
    src = pallas_linear_add(pos, params['pe0']['w'], params['pe0']['b'], src)
    src = mlp_vsa_layer(params['vsa0'], src, inv1, c1, [g, g], 16, 8, batch_size)
    src = pallas_linear_add(pos, params['pe1']['w'], params['pe1']['b'], src)
    src = mlp_vsa_layer(params['vsa1'], src, inv2, c2, [g // 2, g // 2], 32, 8, batch_size)
    src = pallas_linear_add(pos, params['pe2']['w'], params['pe2']['b'], src)
    src = mlp_vsa_layer(params['vsa2'], src, inv4, c4, [g // 4, g // 4], 64, 8, batch_size)
    src = pallas_linear_add(pos, params['pe3']['w'], params['pe3']['b'], src)
    src = mlp_vsa_layer(params['vsa3'], src, inv8, c8, [g // 8, g // 8], 128, 8, batch_size)

    # post_mlp: (Linear+BN+ReLU) x2 + (Linear+BN), fused into one kernel
    layers = [linear_bn_fold(lin['w'], lin['b'], bn, 1e-3) for (lin, bn) in params['post']]
    src = pallas_mlp(src, layers, [True, True, False], tm=1024)

    # pillar features + PointPillarScatter
    pillar = jnp.maximum(jax.ops.segment_max(src, inv1, num_segments=c1.shape[0]), 0.0)
    nx = ny = g
    vc = c1[:, jnp.array([0, 2, 1])]                 # (batch, x, y)
    indices = vc[:, 1] * nx + vc[:, 2]
    out = jnp.zeros((batch_size, 64, ny * nx), jnp.float32)
    out = out.at[vc[:, 0], :, indices].set(pillar)
    return out.reshape(batch_size, 64, ny, nx)


if __name__ == "__main__":
    key = jax.random.PRNGKey(0)
    pkey, dkey = jax.random.split(key)
    params = build_params(pkey)

    GRID = 32   # small stand-in for the module's 256x256 BEV grid (semantics unchanged)
    N_POINTS = 64
    k1, k2 = jax.random.split(dkey)
    batch_idx = (jnp.arange(N_POINTS) % 2).astype(jnp.float32)[:, None]
    pos_xy = jax.random.uniform(k1, (N_POINTS, 2), minval=0.5, maxval=GRID - 0.5)
    feats = jax.random.normal(k2, (N_POINTS, 7), jnp.float32)
    points = jnp.concatenate([batch_idx, pos_xy, feats], axis=1)  # (N, 10): [batch, y, x, 7 feats]

    out = voxset_forward(params, points, GRID)
    out = jax.block_until_ready(out)
    assert out.shape == (2, 64, GRID, GRID), out.shape
    assert bool(jnp.all(jnp.isfinite(out)))
    print("KERNEL_OK")
</pallas_src>

<mosaic_0001>
module attributes {stable_mosaic.version = 11 : i64} {
  func.func @_mlp_kernel(%arg0: i32, %arg1: memref<1024x9xf32, #tpu.memory_space<vmem>>, %arg2: memref<9x16xbf16, #tpu.memory_space<vmem>>, %arg3: memref<1x16xf32, #tpu.memory_space<vmem>>, %arg4: memref<16x16xbf16, #tpu.memory_space<vmem>>, %arg5: memref<1x16xf32, #tpu.memory_space<vmem>>, %arg6: memref<1024x16xf32, #tpu.memory_space<vmem>>) attributes {dimension_semantics = [#tpu.dimension_semantics<parallel>], iteration_bounds = array<i64: 1>, scalar_prefetch = 0 : i64, scratch_operands = 0 : i64, tpu.core_type = #tpu.core_type<tc>, window_params = [{transform_indices = @transform_0, window_bounds = array<i64: 1024, 9>}, {pipeline_mode = #tpu.pipeline_mode<synchronous>, transform_indices = @transform_1, window_bounds = array<i64: 9, 16>}, {pipeline_mode = #tpu.pipeline_mode<synchronous>, transform_indices = @transform_2, window_bounds = array<i64: 1, 16>}, {pipeline_mode = #tpu.pipeline_mode<synchronous>, transform_indices = @transform_3, window_bounds = array<i64: 16, 16>}, {pipeline_mode = #tpu.pipeline_mode<synchronous>, transform_indices = @transform_4, window_bounds = array<i64: 1, 16>}, {transform_indices = @transform_5, window_bounds = array<i64: 1024, 16>}]} {
    %c0 = arith.constant 0 : index
    %c0_0 = arith.constant 0 : index
    %0 = vector.load %arg1[%c0, %c0_0] : memref<1024x9xf32, #tpu.memory_space<vmem>>, vector<1024x9xf32>
    %c0_1 = arith.constant 0 : index
    %c0_2 = arith.constant 0 : index
    %1 = vector.load %arg2[%c0_1, %c0_2] : memref<9x16xbf16, #tpu.memory_space<vmem>>, vector<9x16xbf16>
    %c0_3 = arith.constant 0 : index
    %c0_4 = arith.constant 0 : index
    %2 = vector.load %arg3[%c0_3, %c0_4] : memref<1x16xf32, #tpu.memory_space<vmem>>, vector<1x16xf32>
    %3 = arith.truncf %0 : vector<1024x9xf32> to vector<1024x9xbf16>
    %cst = arith.constant dense<0.000000e+00> : vector<1024x16xf32>
    %4 = tpu.matmul %3, %1, %cst {dimension_numbers = #tpu.dot_dimension_numbers<[1], [0], [0], [1], [0, 0, 1, 1], [], []>} : vector<1024x9xbf16>, vector<9x16xbf16>, vector<1024x16xf32> -> vector<1024x16xf32>
    %5 = vector.broadcast %2 : vector<1x16xf32> to vector<1024x16xf32>
    %6 = arith.addf %4, %5 : vector<1024x16xf32>
    %cst_5 = arith.constant 0.000000e+00 : f32
    %7 = vector.broadcast %cst_5 : f32 to vector<1024x16xf32>
    %8 = arith.maximumf %6, %7 : vector<1024x16xf32>
    %c0_6 = arith.constant 0 : index
    %c0_7 = arith.constant 0 : index
    %9 = vector.load %arg4[%c0_6, %c0_7] : memref<16x16xbf16, #tpu.memory_space<vmem>>, vector<16x16xbf16>
    %c0_8 = arith.constant 0 : index
    %c0_9 = arith.constant 0 : index
    %10 = vector.load %arg5[%c0_8, %c0_9] : memref<1x16xf32, #tpu.memory_space<vmem>>, vector<1x16xf32>
    %11 = arith.truncf %8 : vector<1024x16xf32> to vector<1024x16xbf16>
    %cst_10 = arith.constant dense<0.000000e+00> : vector<1024x16xf32>
    %12 = tpu.matmul %11, %9, %cst_10 {dimension_numbers = #tpu.dot_dimension_numbers<[1], [0], [0], [1], [0, 0, 1, 1], [], []>} : vector<1024x16xbf16>, vector<16x16xbf16>, vector<1024x16xf32> -> vector<1024x16xf32>
    %13 = vector.broadcast %10 : vector<1x16xf32> to vector<1024x16xf32>
    %14 = arith.addf %12, %13 : vector<1024x16xf32>
    %c0_11 = arith.constant 0 : index
    %c0_12 = arith.constant 0 : index
    %15 = vector.load %arg6[%c0_11, %c0_12] : memref<1024x16xf32, #tpu.memory_space<vmem>>, vector<1024x16xf32>
    tpu.vector_store %arg6[%c0_11, %c0_12], %14 {strides = array<i32>} : memref<1024x16xf32, #tpu.memory_space<vmem>>, vector<1024x16xf32>,
    return
  }
  func.func @transform_0(%arg0: i32) -> (i32, i32) {
    %c0_i32 = arith.constant 0 : i32
    %c0_i32_0 = arith.constant 0 : i32
    return %arg0, %c0_i32 : i32, i32
  }
  func.func @transform_1(%arg0: i32) -> (i32, i32) {
    %c0_i32 = arith.constant 0 : i32
    %c0_i32_0 = arith.constant 0 : i32
    %c0_i32_1 = arith.constant 0 : i32
    return %c0_i32, %c0_i32_0 : i32, i32
  }
  func.func @transform_2(%arg0: i32) -> (i32, i32) {
    %c0_i32 = arith.constant 0 : i32
    %c0_i32_0 = arith.constant 0 : i32
    %c0_i32_1 = arith.constant 0 : i32
    return %c0_i32, %c0_i32_0 : i32, i32
  }
  func.func @transform_3(%arg0: i32) -> (i32, i32) {
    %c0_i32 = arith.constant 0 : i32
    %c0_i32_0 = arith.constant 0 : i32
    %c0_i32_1 = arith.constant 0 : i32
    return %c0_i32, %c0_i32_0 : i32, i32
  }
  func.func @transform_4(%arg0: i32) -> (i32, i32) {
    %c0_i32 = arith.constant 0 : i32
    %c0_i32_0 = arith.constant 0 : i32
    %c0_i32_1 = arith.constant 0 : i32
    return %c0_i32, %c0_i32_0 : i32, i32
  }
  func.func @transform_5(%arg0: i32) -> (i32, i32) {
    %c0_i32 = arith.constant 0 : i32
    %c0_i32_0 = arith.constant 0 : i32
    return %arg0, %c0_i32 : i32, i32
  }
}

</mosaic_0001>

<bundles_post_ra>
// kernel: tpu_custom_call.1
= control target key start
LH: loop header
LB: loop body
LE: loop exit
PB: predicated region body
PF: predicated region fallthrough
CT: control target
= control target key end

     0   :  { %vm420_vm0 = vcmask 1043456   ;;  %vm421_vm1 = vcmask 1044480   ;;  %v2575_v1 = vmov 65535   ;;  %vm227_vm2 = vcmask 72704   ;;  %s3907_s1 = inlined_call_operand.vmem [shape: bf16[9,16], index: 1, kind: input, shape index: {}]   ;;  %s3908_s0 = inlined_call_operand.vmem [shape: f32[1024,9], index: 0, kind: input, shape index: {}]   ;;  %s3909_s3 = inlined_call_operand.vmem [shape: bf16[16,16], index: 3, kind: input, shape index: {}]   ;;  %s3910_s2 = inlined_call_operand.vmem [shape: f32[1,16], index: 2, kind: input, shape index: {}]   ;;  %s3911_s4 = inlined_call_operand.vmem [shape: f32[1,16], index: 4, kind: input, shape index: {}]   ;;  %s3912_s5 = inlined_call_operand.vmem [shape: f32[1024,16], index: 5, kind: output, shape index: {}]  }
   0x1   :  { %v2572_v0 = vld [vmem:[%s3907_s1] sm:$0x1f]   ;;  %v422_v2 = vsel %vm420_vm0, 4294967295, %v2575_v1  ;;  %v22_v4 = vld [vmem:[%s3908_s0 + $0x8] sm:$0xff]  ;;  %v23_v7 = vld [vmem:[%s3908_s0 + $0x10] sm:$0xff]  ;;  %vm1179_vm3 = vcmask 130048  }
   0x2   :  { %v21_v3 = vld [vmem:[%s3908_s0] sm:$0xff]  ;;  %v423_v5 = vsel %vm421_vm1, %v422_v2, 0  ;;  %v24_v8 = vld [vmem:[%s3908_s0 + $0x18] sm:$0xff]  ;;  %v26_v11 = vld [vmem:[%s3908_s0 + $0x28] sm:$0xff] }
   0x3   :  { %v152_v6 = vpack.c.bf16 %v22_v4, %v21_v3  ;;  %v425_v9 = vand.u32 %v2572_v0, %v423_v5  ;;  %v25_v10 = vld [vmem:[%s3908_s0 + $0x20] sm:$0xff]  ;;  %v153_v12 = vpack.c.bf16 %v24_v8, %v23_v7  ;;  %v27_v14 = vld [vmem:[%s3908_s0 + $0x30] sm:$0xff]  ;;  %v28_v15 = vld [vmem:[%s3908_s0 + $0x38] sm:$0xff] }
   0x4   :  { %v154_v13 = vpack.c.bf16 %v26_v11, %v25_v10  ;;  %v29_v16 = vld [vmem:[%s3908_s0 + $0x40] sm:$0xff]  ;;  %v30_v17 = vld [vmem:[%s3908_s0 + $0x48] sm:$0xff]  ;;  %v155_v18 = vpack.c.bf16 %v28_v15, %v27_v14  ;;  %v31_v20 = vld [vmem:[%s3908_s0 + $0x50] sm:$0xff] }
   0x5   :  { %2313 = vmatprep.mubr.msk.bf16.mxu0 %vm227_vm2, %v152_v6  ;;  %2311 = vmatprep.subr.bf16.mxu0 %v425_v9  ;;  %v156_v19 = vpack.c.bf16 %v30_v17, %v29_v16  ;;  %v32_v21 = vld [vmem:[%s3908_s0 + $0x58] sm:$0xff]  ;;  %v33_v22 = vld [vmem:[%s3908_s0 + $0x60] sm:$0xff]  ;;  %v34_v23 = vld [vmem:[%s3908_s0 + $0x68] sm:$0xff] }
   0x6   :  { %2312 = vmatpush3.bf16.msra.mxu0 %v425_v9  ;;  %v157_v24 = vpack.c.bf16 %v32_v21, %v31_v20  ;;  %v158_v25 = vpack.c.bf16 %v34_v23, %v33_v22  ;;  %v35_v26 = vld [vmem:[%s3908_s0 + $0x70] sm:$0xff]  ;;  %v36_v27 = vld [vmem:[%s3908_s0 + $0x78] sm:$0xff]  ;;  %v37_v28 = vld [vmem:[%s3908_s0 + $0x80] sm:$0xff] }
   0x7   :  { %v38_v29 = vld [vmem:[%s3908_s0 + $0x88] sm:$0xff]  ;;  %v159_v30 = vpack.c.bf16 %v36_v27, %v35_v26  ;;  %v39_v32 = vld [vmem:[%s3908_s0 + $0x90] sm:$0xff]  ;;  %v40_v33 = vld [vmem:[%s3908_s0 + $0x98] sm:$0xff] }
   0x8   :  { %v160_v31 = vpack.c.bf16 %v38_v29, %v37_v28  ;;  %v41_v34 = vld [vmem:[%s3908_s0 + $0xa0] sm:$0xff]  ;;  %v42_v35 = vld [vmem:[%s3908_s0 + $0xa8] sm:$0xff]  ;;  %v161_v36 = vpack.c.bf16 %v40_v33, %v39_v32  ;;  %v43_v38 = vld [vmem:[%s3908_s0 + $0xb0] sm:$0xff] }
   0x9   :  { %2314 = vmatmul.mubr.msk.bf16.vlgmr.msra.gmra.mxu0 %vm227_vm2, %v153_v12  ;;  %v162_v37 = vpack.c.bf16 %v42_v35, %v41_v34  ;;  %v44_v39 = vld [vmem:[%s3908_s0 + $0xb8] sm:$0xff]  ;;  %v45_v40 = vld [vmem:[%s3908_s0 + $0xc0] sm:$0xff]  ;;  %v46_v41 = vld [vmem:[%s3908_s0 + $0xc8] sm:$0xff] }
   0xa   :  { %2317 = vmatprep.mubr.msk.bf16.mxu0 %vm227_vm2, %v154_v13  ;;  %v163_v42 = vpack.c.bf16 %v44_v39, %v43_v38  ;;  %v164_v43 = vpack.c.bf16 %v46_v41, %v45_v40  ;;  %v47_v44 = vld [vmem:[%s3908_s0 + $0xd0] sm:$0xff]  ;;  %v48_v45 = vld [vmem:[%s3908_s0 + $0xd8] sm:$0xff]  ;;  %v49_v46 = vld [vmem:[%s3908_s0 + $0xe0] sm:$0xff] }
   0xb   :  { %v50_v47 = vld [vmem:[%s3908_s0 + $0xe8] sm:$0xff]  ;;  %v165_v48 = vpack.c.bf16 %v48_v45, %v47_v44  ;;  %v51_v50 = vld [vmem:[%s3908_s0 + $0xf0] sm:$0xff]  ;;  %v52_v51 = vld [vmem:[%s3908_s0 + $0xf8] sm:$0xff] }
   0xc   :  { %v166_v49 = vpack.c.bf16 %v50_v47, %v49_v46  ;;  %v53_v52 = vld [vmem:[%s3908_s0 + $0x100] sm:$0xff]  ;;  %v54_v53 = vld [vmem:[%s3908_s0 + $0x108] sm:$0xff]  ;;  %v167_v54 = vpack.c.bf16 %v52_v51, %v51_v50  ;;  %v55_v56 = vld [vmem:[%s3908_s0 + $0x110] sm:$0xff] }
   0xd   :  { %v168_v55 = vpack.c.bf16 %v54_v53, %v53_v52  ;;  %v56_v57 = vld [vmem:[%s3908_s0 + $0x118] sm:$0xff]  ;;  %v57_v58 = vld [vmem:[%s3908_s0 + $0x120] sm:$0xff]  ;;  %v58_v59 = vld [vmem:[%s3908_s0 + $0x128] sm:$0xff] }
   0xe   :  { %v169_v60 = vpack.c.bf16 %v56_v57, %v55_v56  ;;  %v170_v61 = vpack.c.bf16 %v58_v59, %v57_v58  ;;  %v59_v62 = vld [vmem:[%s3908_s0 + $0x130] sm:$0xff]  ;;  %v60_v63 = vld [vmem:[%s3908_s0 + $0x138] sm:$0xff]  ;;  %v61_v0 = vld [vmem:[%s3908_s0 + $0x140] sm:$0xff] }
   0xf   :  { %v62_v1 = vld [vmem:[%s3908_s0 + $0x148] sm:$0xff]  ;;  %v171_v2 = vpack.c.bf16 %v60_v63, %v59_v62  ;;  %v2573_v4 = vld [vmem:[%s3909_s3] sm:$0xff]   ;;  %v63_v5 = vld [vmem:[%s3908_s0 + $0x150] sm:$0xff] }
  0x10   :  { %v172_v3 = vpack.c.bf16 %v62_v1, %v61_v0  ;;  %v64_v6 = vld [vmem:[%s3908_s0 + $0x158] sm:$0xff]  ;;  %v65_v7 = vld [vmem:[%s3908_s0 + $0x160] sm:$0xff]  ;;  %v66_v8 = vld [vmem:[%s3908_s0 + $0x168] sm:$0xff]  ;;  %2441 = vmatprep.subr.bf16.mxu1 %v2573_v4 }
  0x11   :  { %2318 = vmatmul.mubr.msk.bf16.gmra.mxu0 %vm227_vm2, %v155_v18  ;;  %2442 = vmatpush3.bf16.msra.mxu1 %v2573_v4  ;;  %v173_v9 = vpack.c.bf16 %v64_v6, %v63_v5  ;;  %v174_v10 = vpack.c.bf16 %v66_v8, %v65_v7  ;;  %v67_v11 = vld [vmem:[%s3908_s0 + $0x170] sm:$0xff]  ;;  %v68_v12 = vld [vmem:[%s3908_s0 + $0x178] sm:$0xff]  ;;  %v69_v13 = vld [vmem:[%s3908_s0 + $0x180] sm:$0xff] }
  0x12   :  { %2321 = vmatprep.mubr.msk.bf16.mxu0 %vm227_vm2, %v156_v19  ;;  %v70_v14 = vld [vmem:[%s3908_s0 + $0x188] sm:$0xff]  ;;  %v175_v15 = vpack.c.bf16 %v68_v12, %v67_v11  ;;  %v71_v17 = vld [vmem:[%s3908_s0 + $0x190] sm:$0xff]  ;;  %v72_v18 = vld [vmem:[%s3908_s0 + $0x198] sm:$0xff] }
  0x13   :  { %v176_v16 = vpack.c.bf16 %v70_v14, %v69_v13  ;;  %v73_v19 = vld [vmem:[%s3908_s0 + $0x1a0] sm:$0xff]  ;;  %v74_v20 = vld [vmem:[%s3908_s0 + $0x1a8] sm:$0xff]  ;;  %v177_v21 = vpack.c.bf16 %v72_v18, %v71_v17  ;;  %v75_v23 = vld [vmem:[%s3908_s0 + $0x1b0] sm:$0xff] }
  0x14   :  { %v178_v22 = vpack.c.bf16 %v74_v20, %v73_v19  ;;  %v78_v26 = vld [vmem:[%s3908_s0 + $0x1c8] sm:$0xff]  ;;  %v79_v29 = vld [vmem:[%s3908_s0 + $0x1d0] sm:$0xff]  ;;  %v108_v8 = vld [vmem:[%s3908_s0 + $0x2b8] sm:$0xff] }
  0x15   :  { %v82_v32 = vld [vmem:[%s3908_s0 + $0x1e8] sm:$0xff]  ;;  %v83_v35 = vld [vmem:[%s3908_s0 + $0x1f0] sm:$0xff]  ;;  %v112_v14 = vld [vmem:[%s3908_s0 + $0x2d8] sm:$0xff] }
  0x16   :  { %v86_v38 = vld [vmem:[%s3908_s0 + $0x208] sm:$0xff]  ;;  %v87_v41 = vld [vmem:[%s3908_s0 + $0x210] sm:$0xff]  ;;  %v116_v20 = vld [vmem:[%s3908_s0 + $0x2f8] sm:$0xff] }
  0x17   :  { %v90_v44 = vld [vmem:[%s3908_s0 + $0x228] sm:$0xff]  ;;  %v91_v47 = vld [vmem:[%s3908_s0 + $0x230] sm:$0xff] }
  0x18   :  { %v94_v50 = vld [vmem:[%s3908_s0 + $0x248] sm:$0xff]  ;;  %v95_v53 = vld [vmem:[%s3908_s0 + $0x250] sm:$0xff] }
  0x19   :  { %2322 = vmatmul.mubr.msk.bf16.gmra.mxu0 %vm227_vm2, %v157_v24  ;;  %v76_v24 = vld [vmem:[%s3908_s0 + $0x1b8] sm:$0xff]  ;;  %v98_v56 = vld [vmem:[%s3908_s0 + $0x268] sm:$0xff]  ;;  %v99_v59 = vld [vmem:[%s3908_s0 + $0x270] sm:$0xff] }
  0x1a   :  { %2325 = vmatprep.mubr.msk.bf16.mxu0 %vm227_vm2, %v158_v25  ;;  %v77_v25 = vld [vmem:[%s3908_s0 + $0x1c0] sm:$0xff]  ;;  %v179_v27 = vpack.c.bf16 %v76_v24, %v75_v23  ;;  %v102_v62 = vld [vmem:[%s3908_s0 + $0x288] sm:$0xff]  ;;  %v103_v1 = vld [vmem:[%s3908_s0 + $0x290] sm:$0xff] }
  0x1b   :  { %v180_v28 = vpack.c.bf16 %v78_v26, %v77_v25  ;;  %v106_v4 = vld [vmem:[%s3908_s0 + $0x2a8] sm:$0xff]  ;;  %v107_v7 = vld [vmem:[%s3908_s0 + $0x2b0] sm:$0xff]  ;;  %v120_v26 = vld [vmem:[%s3908_s0 + $0x318] sm:$0xff] }
  0x1c   :  { %v195_v11 = vpack.c.bf16 %v108_v8, %v107_v7  ;;  %v111_v13 = vld [vmem:[%s3908_s0 + $0x2d0] sm:$0xff]  ;;  %v132_v7 = vld [vmem:[%s3908_s0 + $0x378] sm:$0xff] }
  0x1d   :  { %v197_v17 = vpack.c.bf16 %v112_v14, %v111_v13  ;;  %v115_v19 = vld [vmem:[%s3908_s0 + $0x2f0] sm:$0xff] }
  0x1e   :  { %v199_v23 = vpack.c.bf16 %v116_v20, %v115_v19  ;;  %v119_v25 = vld [vmem:[%s3908_s0 + $0x310] sm:$0xff] }
  0x21   :  { %2326 = vmatmul.mubr.msk.bf16.gmra.mxu0 %vm227_vm2, %v159_v30  ;;  %v80_v30 = vld [vmem:[%s3908_s0 + $0x1d8] sm:$0xff] }
  0x22   :  { %2329 = vmatprep.mubr.msk.bf16.mxu0 %vm227_vm2, %v160_v31  ;;  %v81_v31 = vld [vmem:[%s3908_s0 + $0x1e0] sm:$0xff]  ;;  %v181_v33 = vpack.c.bf16 %v80_v30, %v79_v29  ;;  %v201_v29 = vpack.c.bf16 %v120_v26, %v119_v25  ;;  %v135_v26 = vld [vmem:[%s3908_s0 + $0x390] sm:$0xff] }
  0x23   :  { %v182_v34 = vpack.c.bf16 %v82_v32, %v81_v31  ;;  %v123_v32 = vld [vmem:[%s3908_s0 + $0x330] sm:$0xff] }
  0x29   :  { %2330 = vmatmul.mubr.msk.bf16.gmra.mxu0 %vm227_vm2, %v161_v36  ;;  %v84_v36 = vld [vmem:[%s3908_s0 + $0x1f8] sm:$0xff] }
  0x2a   :  { %2333 = vmatprep.mubr.msk.bf16.mxu0 %vm227_vm2, %v162_v37  ;;  %v85_v37 = vld [vmem:[%s3908_s0 + $0x200] sm:$0xff]  ;;  %v183_v39 = vpack.c.bf16 %v84_v36, %v83_v35  ;;  %v126_v36 = vld [vmem:[%s3908_s0 + $0x348] sm:$0xff] }
  0x2b   :  { %v184_v40 = vpack.c.bf16 %v86_v38, %v85_v37  ;;  %v125_v35 = vld [vmem:[%s3908_s0 + $0x340] sm:$0xff] }
  0x2c   :  { %v2984_v37 = vld [vmem:[%s3910_s2] ss:$0 sm:$0xff] }
  0x31   :  { %2334 = vmatmul.mubr.msk.bf16.gmra.mxu0 %vm227_vm2, %v163_v42  ;;  %v88_v42 = vld [vmem:[%s3908_s0 + $0x218] sm:$0xff] }
  0x32   :  { %2337 = vmatprep.mubr.msk.bf16.mxu0 %vm227_vm2, %v164_v43  ;;  %v89_v43 = vld [vmem:[%s3908_s0 + $0x220] sm:$0xff]  ;;  %v185_v45 = vpack.c.bf16 %v88_v42, %v87_v41  ;;  %v204_v42 = vpack.c.bf16 %v126_v36, %v125_v35 }
  0x33   :  { %v186_v46 = vpack.c.bf16 %v90_v44, %v89_v43 }
  0x39   :  { %2338 = vmatmul.mubr.msk.bf16.gmra.mxu0 %vm227_vm2, %v165_v48  ;;  %v92_v48 = vld [vmem:[%s3908_s0 + $0x238] sm:$0xff] }
  0x3a   :  { %2341 = vmatprep.mubr.msk.bf16.mxu0 %vm227_vm2, %v166_v49  ;;  %v93_v49 = vld [vmem:[%s3908_s0 + $0x240] sm:$0xff]  ;;  %v187_v51 = vpack.c.bf16 %v92_v48, %v91_v47 }
  0x3b   :  { %v188_v52 = vpack.c.bf16 %v94_v50, %v93_v49  ;;  %v127_v50 = vld [vmem:[%s3908_s0 + $0x350] sm:$0xff] }
  0x41   :  { %2342 = vmatmul.mubr.msk.bf16.gmra.mxu0 %vm227_vm2, %v167_v54  ;;  %v96_v54 = vld [vmem:[%s3908_s0 + $0x258] sm:$0xff] }
  0x42   :  { %2345 = vmatprep.mubr.msk.bf16.mxu0 %vm227_vm2, %v168_v55  ;;  %v97_v55 = vld [vmem:[%s3908_s0 + $0x260] sm:$0xff]  ;;  %v189_v57 = vpack.c.bf16 %v96_v54, %v95_v53 }
  0x43   :  { %v190_v58 = vpack.c.bf16 %v98_v56, %v97_v55  ;;  %v129_v54 = vld [vmem:[%s3908_s0 + $0x360] sm:$0xff]  ;;  %v130_v55 = vld [vmem:[%s3908_s0 + $0x368] sm:$0xff] }
  0x49   :  { %2346 = vmatmul.mubr.msk.bf16.gmra.mxu0 %vm227_vm2, %v169_v60  ;;  %v100_v60 = vld [vmem:[%s3908_s0 + $0x278] sm:$0xff] }
  0x4a   :  { %2349 = vmatprep.mubr.msk.bf16.mxu0 %vm227_vm2, %v170_v61  ;;  %v101_v61 = vld [vmem:[%s3908_s0 + $0x280] sm:$0xff]  ;;  %v191_v63 = vpack.c.bf16 %v100_v60, %v99_v59 }
  0x4b   :  { %v192_v0 = vpack.c.bf16 %v102_v62, %v101_v61  ;;  %v206_v62 = vpack.c.bf16 %v130_v55, %v129_v54 }
  0x51   :  { %2350 = vmatmul.mubr.msk.bf16.gmra.mxu0 %vm227_vm2, %v171_v2  ;;  %v104_v2 = vld [vmem:[%s3908_s0 + $0x298] sm:$0xff] }
  0x52   :  { %2353 = vmatprep.mubr.msk.bf16.mxu0 %vm227_vm2, %v172_v3  ;;  %v105_v3 = vld [vmem:[%s3908_s0 + $0x2a0] sm:$0xff]  ;;  %v193_v5 = vpack.c.bf16 %v104_v2, %v103_v1 }
  0x53   :  { %v194_v6 = vpack.c.bf16 %v106_v4, %v105_v3 }
  0x59   :  { %2354 = vmatmul.mubr.msk.bf16.gmra.mxu0 %vm227_vm2, %v173_v9  ;;  %v109_v9 = vld [vmem:[%s3908_s0 + $0x2c0] sm:$0xff] }
  0x5a   :  { %2357 = vmatprep.mubr.msk.bf16.mxu0 %vm227_vm2, %v174_v10  ;;  %v110_v10 = vld [vmem:[%s3908_s0 + $0x2c8] sm:$0xff] }
  0x5b   :  { %v196_v12 = vpack.c.bf16 %v110_v10, %v109_v9  ;;  %v133_v10 = vld [vmem:[%s3908_s0 + $0x380] sm:$0xff] }
  0x61   :  { %2358 = vmatmul.mubr.msk.bf16.gmra.mxu0 %vm227_vm2, %v175_v15  ;;  %v113_v15 = vld [vmem:[%s3908_s0 + $0x2e0] sm:$0xff] }
  0x62   :  { %2361 = vmatprep.mubr.msk.bf16.mxu0 %vm227_vm2, %v176_v16  ;;  %v114_v16 = vld [vmem:[%s3908_s0 + $0x2e8] sm:$0xff] }
  0x63   :  { %v198_v18 = vpack.c.bf16 %v114_v16, %v113_v15 }
  0x69   :  { %2362 = vmatmul.mubr.msk.bf16.gmra.mxu0 %vm227_vm2, %v177_v21  ;;  %v117_v21 = vld [vmem:[%s3908_s0 + $0x300] sm:$0xff] }
  0x6a   :  { %2365 = vmatprep.mubr.msk.bf16.mxu0 %vm227_vm2, %v178_v22  ;;  %v118_v22 = vld [vmem:[%s3908_s0 + $0x308] sm:$0xff] }
  0x6b   :  { %v200_v24 = vpack.c.bf16 %v118_v22, %v117_v21 }
  0x71   :  { %2366 = vmatmul.mubr.msk.bf16.gmra.mxu0 %vm227_vm2, %v179_v27  ;;  %v121_v27 = vld [vmem:[%s3908_s0 + $0x320] sm:$0xff] }
  0x72   :  { %2369 = vmatprep.mubr.msk.bf16.mxu0 %vm227_vm2, %v180_v28  ;;  %v122_v28 = vld [vmem:[%s3908_s0 + $0x328] sm:$0xff] }
  0x73   :  { %v202_v30 = vpack.c.bf16 %v122_v28, %v121_v27  ;;  %v136_v27 = vld [vmem:[%s3908_s0 + $0x398] sm:$0xff] }
  0x74   :  { %v209_v35 = vpack.c.bf16 %v136_v27, %v135_v26 }
  0x79   :  { %2370 = vmatmul.mubr.msk.bf16.gmra.mxu0 %vm227_vm2, %v181_v33  ;;  %v124_v33 = vld [vmem:[%s3908_s0 + $0x338] sm:$0xff] }
  0x7a   :  { %2373 = vmatprep.mubr.msk.bf16.mxu0 %vm227_vm2, %v182_v34 }
  0x81   :  { %2374 = vmatmul.mubr.msk.bf16.gmra.mxu0 %vm227_vm2, %v183_v39  ;;  %v203_v39 = vpack.c.bf16 %v124_v33, %v123_v32 }
  0x82   :  { %2377 = vmatprep.mubr.msk.bf16.mxu0 %vm227_vm2, %v184_v40 }
  0x89   :  { %2378 = vmatmul.mubr.msk.bf16.gmra.mxu0 %vm227_vm2, %v185_v45 }
  0x8a   :  { %2381 = vmatprep.mubr.msk.bf16.mxu0 %vm227_vm2, %v186_v46 }
  0x91   :  { %2382 = vmatmul.mubr.msk.bf16.gmra.mxu0 %vm227_vm2, %v187_v51  ;;  %v128_v51 = vld [vmem:[%s3908_s0 + $0x358] sm:$0xff] }
  0x92   :  { %2385 = vmatprep.mubr.msk.bf16.mxu0 %vm227_vm2, %v188_v52  ;;  %v205_v59 = vpack.c.bf16 %v128_v51, %v127_v50  ;;  %v141_v51 = vld [vmem:[%s3908_s0 + $0x3c0] sm:$0xff] }
  0x99   :  { %2386 = vmatmul.mubr.msk.bf16.gmra.mxu0 %vm227_vm2, %v189_v57 }
  0x9a   :  { %2389 = vmatprep.mubr.msk.bf16.mxu0 %vm227_vm2, %v190_v58 }
  0xa1   :  { %2390 = vmatmul.mubr.msk.bf16.gmra.mxu0 %vm227_vm2, %v191_v63 }
  0xa2   :  { %2393 = vmatprep.mubr.msk.bf16.mxu0 %vm227_vm2, %v192_v0 }
  0xa9   :  { %2394 = vmatmul.mubr.msk.bf16.gmra.mxu0 %vm227_vm2, %v193_v5 }
  0xaa   :  { %2397 = vmatprep.mubr.msk.bf16.mxu0 %vm227_vm2, %v194_v6  ;;  %v131_v6 = vld [vmem:[%s3908_s0 + $0x370] sm:$0xff] }
  0xab   :  { %v207_v15 = vpack.c.bf16 %v132_v7, %v131_v6  ;;  %v145_v7 = vld [vmem:[%s3908_s0 + $0x3e0] sm:$0xff] }
  0xb1   :  { %2398 = vmatmul.mubr.msk.bf16.gmra.mxu0 %vm227_vm2, %v195_v11  ;;  %v134_v11 = vld [vmem:[%s3908_s0 + $0x388] sm:$0xff] }
  0xb2   :  { %2401 = vmatprep.mubr.msk.bf16.mxu0 %vm227_vm2, %v196_v12 }
  0xb9   :  { %2402 = vmatmul.mubr.msk.bf16.gmra.mxu0 %vm227_vm2, %v197_v17 }
  0xba   :  { %2405 = vmatprep.mubr.msk.bf16.mxu0 %vm227_vm2, %v198_v18  ;;  %v208_v18 = vpack.c.bf16 %v134_v11, %v133_v10 }
  0xc1   :  { %2406 = vmatmul.mubr.msk.bf16.gmra.mxu0 %vm227_vm2, %v199_v23 }
  0xc2   :  { %2409 = vmatprep.mubr.msk.bf16.mxu0 %vm227_vm2, %v200_v24 }
  0xc9   :  { %v2315_v31 = vpop.f32.mrf.mxu0  ;;  %2410 = vmatmul.mubr.msk.bf16.gmra.mxu0 %vm227_vm2, %v201_v29 }
  0xca   :  { %2413 = vmatprep.mubr.msk.bf16.mxu0 %vm227_vm2, %v202_v30  ;;  %v470_v43 = vadd.f32 %v2315_v31, %v2984_v37  ;;  %v137_v30 = vld [vmem:[%s3908_s0 + $0x3a0] sm:$0xff]  ;;  %v138_v31 = vld [vmem:[%s3908_s0 + $0x3a8] sm:$0xff] }
  0xcb   :  { %v461_v34 = vpop.f32.mrf.mxu0 }
  0xcc   :  { %v462_v40 = vadd.f32 %v2984_v37, %v461_v34  ;;  %v974_v52 = vmax.f32 %v470_v43, 0.0 }
  0xcd   :  { %v2316_v38 = vpop.f32.mrf.mxu0 }
  0xce   :  { %v473_v41 = vadd.f32 %v2316_v38, %v2984_v37  ;;  %v972_v48 = vmax.f32 %v462_v40, 0.0 }
  0xcf   :  { %v464_v44 = vpop.f32.mrf.mxu0 }
  0xd0   :  { %v465_v45 = vadd.f32 %v2984_v37, %v464_v44  ;;  %v975_v46 = vmax.f32 %v473_v41, 0.0 }
  0xd1   :  { %v2319_v47 = vpop.f32.mrf.mxu0  ;;  %2414 = vmatmul.mubr.msk.bf16.gmra.mxu0 %vm227_vm2, %v203_v39  ;;  %v210_v39 = vpack.c.bf16 %v138_v31, %v137_v30 }
  0xd2   :  { %v973_v49 = vmax.f32 %v465_v45, 0.0  ;;  %2417 = vmatprep.mubr.msk.bf16.mxu0 %vm227_vm2, %v204_v42  ;;  %v1104_v57 = vpack.c.bf16 %v975_v46, %v974_v52  ;;  %v486_v63 = vadd.f32 %v2319_v47, %v2984_v37  ;;  %v139_v47 = vld [vmem:[%s3908_s0 + $0x3b0] sm:$0xff]  ;;  %v142_v52 = vld [vmem:[%s3908_s0 + $0x3c8] sm:$0xff] }
  0xd3   :  { %v477_v53 = vpop.f32.mrf.mxu0 }
  0xd4   :  { %v1103_v56 = vpack.c.bf16 %v973_v49, %v972_v48  ;;  %v478_v60 = vadd.f32 %v2984_v37, %v477_v53  ;;  %v978_v8 = vmax.f32 %v486_v63, 0.0  ;;  %v140_v48 = vld [vmem:[%s3908_s0 + $0x3b8] sm:$0xff] }
  0xd5   :  { %v2320_v58 = vpop.f32.mrf.mxu0 }
  0xd6   :  { %v489_v61 = vadd.f32 %v2320_v58, %v2984_v37  ;;  %2443 = vmatprep.mubr.msk.bf16.mxu1 %vm1179_vm3, %v1103_v56  ;;  %v976_v4 = vmax.f32 %v478_v60, 0.0  ;;  %v211_v56 = vpack.c.bf16 %v140_v48, %v139_v47 }
  0xd7   :  { %v480_v0 = vpop.f32.mrf.mxu0  ;;  %2444 = vmatmul.mubr.msk.bf16.vlgmr.msra.gmra.mxu1 %vm1179_vm3, %v1104_v57 }
  0xd8   :  { %v481_v1 = vadd.f32 %v2984_v37, %v480_v0  ;;  %v979_v2 = vmax.f32 %v489_v61, 0.0 }
  0xd9   :  { %v2323_v3 = vpop.f32.mrf.mxu0  ;;  %2418 = vmatmul.mubr.msk.bf16.gmra.mxu0 %vm227_vm2, %v205_v59  ;;  %v212_v59 = vpack.c.bf16 %v142_v52, %v141_v51 }
  0xda   :  { %v977_v5 = vmax.f32 %v481_v1, 0.0  ;;  %2421 = vmatprep.mubr.msk.bf16.mxu0 %vm227_vm2, %v206_v62  ;;  %v1106_v13 = vpack.c.bf16 %v979_v2, %v978_v8  ;;  %v502_v19 = vadd.f32 %v2323_v3, %v2984_v37  ;;  %v143_v3 = vld [vmem:[%s3908_s0 + $0x3d0] sm:$0xff]  ;;  %v146_v8 = vld [vmem:[%s3908_s0 + $0x3e8] sm:$0xff] }
  0xdb   :  { %v493_v9 = vpop.f32.mrf.mxu0 }
  0xdc   :  { %v1105_v12 = vpack.c.bf16 %v977_v5, %v976_v4  ;;  %v494_v16 = vadd.f32 %v2984_v37, %v493_v9  ;;  %v982_v28 = vmax.f32 %v502_v19, 0.0  ;;  %v144_v4 = vld [vmem:[%s3908_s0 + $0x3d8] sm:$0xff] }
  0xdd   :  { %v2324_v14 = vpop.f32.mrf.mxu0 }
  0xde   :  { %v505_v17 = vadd.f32 %v2324_v14, %v2984_v37  ;;  %2447 = vmatprep.mubr.msk.bf16.mxu1 %vm1179_vm3, %v1105_v12  ;;  %v980_v24 = vmax.f32 %v494_v16, 0.0  ;;  %v213_v12 = vpack.c.bf16 %v144_v4, %v143_v3 }
  0xdf   :  { %v496_v20 = vpop.f32.mrf.mxu0  ;;  %2448 = vmatmul.mubr.msk.bf16.gmra.mxu1 %vm1179_vm3, %v1106_v13 }
  0xe0   :  { %v497_v21 = vadd.f32 %v2984_v37, %v496_v20  ;;  %v983_v22 = vmax.f32 %v505_v17, 0.0 }
  0xe1   :  { %v2327_v23 = vpop.f32.mrf.mxu0  ;;  %2422 = vmatmul.mubr.msk.bf16.gmra.mxu0 %vm227_vm2, %v207_v15  ;;  %v214_v15 = vpack.c.bf16 %v146_v8, %v145_v7 }
  0xe2   :  { %v981_v25 = vmax.f32 %v497_v21, 0.0  ;;  %2425 = vmatprep.mubr.msk.bf16.mxu0 %vm227_vm2, %v208_v18  ;;  %v1108_v33 = vpack.c.bf16 %v983_v22, %v982_v28  ;;  %v518_v40 = vadd.f32 %v2327_v23, %v2984_v37  ;;  %v147_v23 = vld [vmem:[%s3908_s0 + $0x3f0] sm:$0xff] }
  0xe3   :  { %v509_v29 = vpop.f32.mrf.mxu0 }
  0xe4   :  { %v1107_v32 = vpack.c.bf16 %v981_v25, %v980_v24  ;;  %v510_v36 = vadd.f32 %v2984_v37, %v509_v29  ;;  %v986_v49 = vmax.f32 %v518_v40, 0.0  ;;  %v148_v24 = vld [vmem:[%s3908_s0 + $0x3f8] sm:$0xff] }
  0xe5   :  { %v2328_v34 = vpop.f32.mrf.mxu0  ;;  %v215_v30 = vpack.c.bf16 %v148_v24, %v147_v23 }
  0xe6   :  { %v521_v38 = vadd.f32 %v2328_v34, %v2984_v37  ;;  %2451 = vmatprep.mubr.msk.bf16.mxu1 %vm1179_vm3, %v1107_v32  ;;  %v984_v45 = vmax.f32 %v510_v36, 0.0 }
  0xe7   :  { %v512_v41 = vpop.f32.mrf.mxu0  ;;  %2452 = vmatmul.mubr.msk.bf16.gmra.mxu1 %vm1179_vm3, %v1108_v33 }
  0xe8   :  { %v513_v42 = vadd.f32 %v2984_v37, %v512_v41  ;;  %v987_v43 = vmax.f32 %v521_v38, 0.0 }
  0xe9   :  { %v2331_v44 = vpop.f32.mrf.mxu0  ;;  %2426 = vmatmul.mubr.msk.bf16.gmra.mxu0 %vm227_vm2, %v209_v35 }
  0xea   :  { %v985_v46 = vmax.f32 %v513_v42, 0.0  ;;  %2429 = vmatprep.mubr.msk.bf16.mxu0 %vm227_vm2, %v210_v39  ;;  %v1110_v54 = vpack.c.bf16 %v987_v43, %v986_v49  ;;  %v534_v60 = vadd.f32 %v2331_v44, %v2984_v37 }
  0xeb   :  { %v525_v50 = vpop.f32.mrf.mxu0 }
  0xec   :  { %v1109_v53 = vpack.c.bf16 %v985_v46, %v984_v45  ;;  %v526_v57 = vadd.f32 %v2984_v37, %v525_v50  ;;  %v990_v5 = vmax.f32 %v534_v60, 0.0 }
  0xed   :  { %v2332_v55 = vpop.f32.mrf.mxu0 }
  0xee   :  { %v537_v58 = vadd.f32 %v2332_v55, %v2984_v37  ;;  %2455 = vmatprep.mubr.msk.bf16.mxu1 %vm1179_vm3, %v1109_v53  ;;  %v988_v1 = vmax.f32 %v526_v57, 0.0 }
  0xef   :  { %v528_v61 = vpop.f32.mrf.mxu0  ;;  %2456 = vmatmul.mubr.msk.bf16.gmra.mxu1 %vm1179_vm3, %v1110_v54 }
  0xf0   :  { %v529_v62 = vadd.f32 %v2984_v37, %v528_v61  ;;  %v991_v63 = vmax.f32 %v537_v58, 0.0 }
  0xf1   :  { %v2335_v0 = vpop.f32.mrf.mxu0  ;;  %2430 = vmatmul.mubr.msk.bf16.gmra.mxu0 %vm227_vm2, %v211_v56 }
  0xf2   :  { %v989_v2 = vmax.f32 %v529_v62, 0.0  ;;  %2433 = vmatprep.mubr.msk.bf16.mxu0 %vm227_vm2, %v212_v59  ;;  %v1112_v10 = vpack.c.bf16 %v991_v63, %v990_v5  ;;  %v550_v16 = vadd.f32 %v2335_v0, %v2984_v37 }
  0xf3   :  { %v541_v6 = vpop.f32.mrf.mxu0 }
  0xf4   :  { %v1111_v9 = vpack.c.bf16 %v989_v2, %v988_v1  ;;  %v542_v13 = vadd.f32 %v2984_v37, %v541_v6  ;;  %v994_v25 = vmax.f32 %v550_v16, 0.0 }
  0xf5   :  { %v2336_v11 = vpop.f32.mrf.mxu0 }
  0xf6   :  { %v553_v14 = vadd.f32 %v2336_v11, %v2984_v37  ;;  %2459 = vmatprep.mubr.msk.bf16.mxu1 %vm1179_vm3, %v1111_v9  ;;  %v992_v21 = vmax.f32 %v542_v13, 0.0 }
  0xf7   :  { %v544_v17 = vpop.f32.mrf.mxu0  ;;  %2460 = vmatmul.mubr.msk.bf16.gmra.mxu1 %vm1179_vm3, %v1112_v10 }
  0xf8   :  { %v545_v18 = vadd.f32 %v2984_v37, %v544_v17  ;;  %v995_v19 = vmax.f32 %v553_v14, 0.0 }
  0xf9   :  { %v2339_v20 = vpop.f32.mrf.mxu0  ;;  %2434 = vmatmul.mubr.msk.bf16.gmra.mxu0 %vm227_vm2, %v213_v12 }
  0xfa   :  { %v993_v22 = vmax.f32 %v545_v18, 0.0  ;;  %2437 = vmatprep.mubr.msk.bf16.mxu0 %vm227_vm2, %v214_v15  ;;  %v1114_v28 = vpack.c.bf16 %v995_v19, %v994_v25  ;;  %v566_v33 = vadd.f32 %v2339_v20, %v2984_v37 }
  0xfb   :  { %v557_v26 = vpop.f32.mrf.mxu0 }
  0xfc   :  { %v1113_v27 = vpack.c.bf16 %v993_v22, %v992_v21  ;;  %v558_v31 = vadd.f32 %v2984_v37, %v557_v26  ;;  %v998_v41 = vmax.f32 %v566_v33, 0.0 }
  0xfd   :  { %v2340_v29 = vpop.f32.mrf.mxu0 }
  0xfe   :  { %v569_v32 = vadd.f32 %v2340_v29, %v2984_v37  ;;  %2463 = vmatprep.mubr.msk.bf16.mxu1 %vm1179_vm3, %v1113_v27  ;;  %v996_v39 = vmax.f32 %v558_v31, 0.0 }
  0xff   :  { %v560_v34 = vpop.f32.mrf.mxu0  ;;  %2464 = vmatmul.mubr.msk.bf16.gmra.mxu1 %vm1179_vm3, %v1114_v28 }
 0x100   :  { %v561_v35 = vadd.f32 %v2984_v37, %v560_v34  ;;  %v999_v36 = vmax.f32 %v569_v32, 0.0 }
 0x101   :  { %v2343_v38 = vpop.f32.mrf.mxu0  ;;  %2438 = vmatmul.mubr.msk.bf16.gmra.mxu0 %vm227_vm2, %v215_v30 }
 0x102   :  { %v997_v40 = vmax.f32 %v561_v35, 0.0  ;;  %v1116_v44 = vpack.c.bf16 %v999_v36, %v998_v41  ;;  %v582_v48 = vadd.f32 %v2343_v38, %v2984_v37 }
 0x103   :  { %v573_v42 = vpop.f32.mrf.mxu0 }
 0x104   :  { %v1115_v43 = vpack.c.bf16 %v997_v40, %v996_v39  ;;  %v574_v46 = vadd.f32 %v2984_v37, %v573_v42  ;;  %v1002_v55 = vmax.f32 %v582_v48, 0.0 }
 0x105   :  { %v2344_v45 = vpop.f32.mrf.mxu0 }
 0x106   :  { %v585_v47 = vadd.f32 %v2344_v45, %v2984_v37  ;;  %2467 = vmatprep.mubr.msk.bf16.mxu1 %vm1179_vm3, %v1115_v43  ;;  %v1000_v53 = vmax.f32 %v574_v46, 0.0 }
 0x107   :  { %v576_v49 = vpop.f32.mrf.mxu0  ;;  %2468 = vmatmul.mubr.msk.bf16.gmra.mxu1 %vm1179_vm3, %v1116_v44 }
 0x108   :  { %v577_v50 = vadd.f32 %v2984_v37, %v576_v49  ;;  %v1003_v51 = vmax.f32 %v585_v47, 0.0 }
 0x109   :  { %v2347_v52 = vpop.f32.mrf.mxu0 }
 0x10a   :  { %v1001_v54 = vmax.f32 %v577_v50, 0.0  ;;  %v1118_v58 = vpack.c.bf16 %v1003_v51, %v1002_v55  ;;  %v598_v62 = vadd.f32 %v2347_v52, %v2984_v37 }
 0x10b   :  { %v589_v56 = vpop.f32.mrf.mxu0 }
 0x10c   :  { %v1117_v57 = vpack.c.bf16 %v1001_v54, %v1000_v53  ;;  %v590_v60 = vadd.f32 %v2984_v37, %v589_v56  ;;  %v1006_v5 = vmax.f32 %v598_v62, 0.0 }
 0x10d   :  { %v2348_v59 = vpop.f32.mrf.mxu0 }
 0x10e   :  { %v601_v61 = vadd.f32 %v2348_v59, %v2984_v37  ;;  %2471 = vmatprep.mubr.msk.bf16.mxu1 %vm1179_vm3, %v1117_v57  ;;  %v1004_v3 = vmax.f32 %v590_v60, 0.0 }
 0x10f   :  { %v592_v63 = vpop.f32.mrf.mxu0  ;;  %2472 = vmatmul.mubr.msk.bf16.gmra.mxu1 %vm1179_vm3, %v1118_v58 }
 0x110   :  { %v593_v0 = vadd.f32 %v2984_v37, %v592_v63  ;;  %v1007_v1 = vmax.f32 %v601_v61, 0.0 }
 0x111   :  { %v2351_v2 = vpop.f32.mrf.mxu0 }
 0x112   :  { %v1005_v4 = vmax.f32 %v593_v0, 0.0  ;;  %v1120_v8 = vpack.c.bf16 %v1007_v1, %v1006_v5  ;;  %v614_v12 = vadd.f32 %v2351_v2, %v2984_v37 }
 0x113   :  { %v605_v6 = vpop.f32.mrf.mxu0 }
 0x114   :  { %v1119_v7 = vpack.c.bf16 %v1005_v4, %v1004_v3  ;;  %v606_v10 = vadd.f32 %v2984_v37, %v605_v6  ;;  %v1010_v19 = vmax.f32 %v614_v12, 0.0 }
 0x115   :  { %v2352_v9 = vpop.f32.mrf.mxu0 }
 0x116   :  { %v617_v11 = vadd.f32 %v2352_v9, %v2984_v37  ;;  %2475 = vmatprep.mubr.msk.bf16.mxu1 %vm1179_vm3, %v1119_v7  ;;  %v1008_v17 = vmax.f32 %v606_v10, 0.0 }
 0x117   :  { %v608_v13 = vpop.f32.mrf.mxu0  ;;  %2476 = vmatmul.mubr.msk.bf16.gmra.mxu1 %vm1179_vm3, %v1120_v8 }
 0x118   :  { %v609_v14 = vadd.f32 %v2984_v37, %v608_v13  ;;  %v1011_v15 = vmax.f32 %v617_v11, 0.0 }
 0x119   :  { %v2355_v16 = vpop.f32.mrf.mxu0 }
 0x11a   :  { %v1009_v18 = vmax.f32 %v609_v14, 0.0  ;;  %v1122_v22 = vpack.c.bf16 %v1011_v15, %v1010_v19  ;;  %v630_v26 = vadd.f32 %v2355_v16, %v2984_v37 }
 0x11b   :  { %v621_v20 = vpop.f32.mrf.mxu0 }
 0x11c   :  { %v1121_v21 = vpack.c.bf16 %v1009_v18, %v1008_v17  ;;  %v622_v24 = vadd.f32 %v2984_v37, %v621_v20  ;;  %v1014_v33 = vmax.f32 %v630_v26, 0.0 }
 0x11d   :  { %v2356_v23 = vpop.f32.mrf.mxu0 }
 0x11e   :  { %v633_v25 = vadd.f32 %v2356_v23, %v2984_v37  ;;  %2479 = vmatprep.mubr.msk.bf16.mxu1 %vm1179_vm3, %v1121_v21  ;;  %v1012_v31 = vmax.f32 %v622_v24, 0.0 }
 0x11f   :  { %v624_v27 = vpop.f32.mrf.mxu0  ;;  %2480 = vmatmul.mubr.msk.bf16.gmra.mxu1 %vm1179_vm3, %v1122_v22 }
 0x120   :  { %v625_v28 = vadd.f32 %v2984_v37, %v624_v27  ;;  %v1015_v29 = vmax.f32 %v633_v25, 0.0 }
 0x121   :  { %v2359_v30 = vpop.f32.mrf.mxu0 }
 0x122   :  { %v1013_v32 = vmax.f32 %v625_v28, 0.0  ;;  %v1124_v36 = vpack.c.bf16 %v1015_v29, %v1014_v33  ;;  %v646_v41 = vadd.f32 %v2359_v30, %v2984_v37 }
 0x123   :  { %v637_v34 = vpop.f32.mrf.mxu0 }
 0x124   :  { %v1123_v35 = vpack.c.bf16 %v1013_v32, %v1012_v31  ;;  %v638_v39 = vadd.f32 %v2984_v37, %v637_v34  ;;  %v1018_v48 = vmax.f32 %v646_v41, 0.0 }
 0x125   :  { %v2360_v38 = vpop.f32.mrf.mxu0 }
 0x126   :  { %v649_v40 = vadd.f32 %v2360_v38, %v2984_v37  ;;  %2483 = vmatprep.mubr.msk.bf16.mxu1 %vm1179_vm3, %v1123_v35  ;;  %v1016_v46 = vmax.f32 %v638_v39, 0.0 }
 0x127   :  { %v640_v42 = vpop.f32.mrf.mxu0  ;;  %2484 = vmatmul.mubr.msk.bf16.gmra.mxu1 %vm1179_vm3, %v1124_v36 }
 0x128   :  { %v641_v43 = vadd.f32 %v2984_v37, %v640_v42  ;;  %v1019_v44 = vmax.f32 %v649_v40, 0.0 }
 0x129   :  { %v2363_v45 = vpop.f32.mrf.mxu0 }
 0x12a   :  { %v1017_v47 = vmax.f32 %v641_v43, 0.0  ;;  %v1126_v51 = vpack.c.bf16 %v1019_v44, %v1018_v48  ;;  %v662_v55 = vadd.f32 %v2363_v45, %v2984_v37 }
 0x12b   :  { %v653_v49 = vpop.f32.mrf.mxu0 }
 0x12c   :  { %v1125_v50 = vpack.c.bf16 %v1017_v47, %v1016_v46  ;;  %v654_v53 = vadd.f32 %v2984_v37, %v653_v49  ;;  %v1022_v62 = vmax.f32 %v662_v55, 0.0 }
 0x12d   :  { %v2364_v52 = vpop.f32.mrf.mxu0 }
 0x12e   :  { %v665_v54 = vadd.f32 %v2364_v52, %v2984_v37  ;;  %2487 = vmatprep.mubr.msk.bf16.mxu1 %vm1179_vm3, %v1125_v50  ;;  %v1020_v60 = vmax.f32 %v654_v53, 0.0 }
 0x12f   :  { %v656_v56 = vpop.f32.mrf.mxu0  ;;  %2488 = vmatmul.mubr.msk.bf16.gmra.mxu1 %vm1179_vm3, %v1126_v51 }
 0x130   :  { %v657_v57 = vadd.f32 %v2984_v37, %v656_v56  ;;  %v1023_v58 = vmax.f32 %v665_v54, 0.0 }
 0x131   :  { %v2367_v59 = vpop.f32.mrf.mxu0 }
 0x132   :  { %v1021_v61 = vmax.f32 %v657_v57, 0.0  ;;  %v1128_v1 = vpack.c.bf16 %v1023_v58, %v1022_v62  ;;  %v678_v5 = vadd.f32 %v2367_v59, %v2984_v37 }
 0x133   :  { %v669_v63 = vpop.f32.mrf.mxu0 }
 0x134   :  { %v1127_v0 = vpack.c.bf16 %v1021_v61, %v1020_v60  ;;  %v670_v3 = vadd.f32 %v2984_v37, %v669_v63  ;;  %v1026_v12 = vmax.f32 %v678_v5, 0.0 }
 0x135   :  { %v2368_v2 = vpop.f32.mrf.mxu0 }
 0x136   :  { %v681_v4 = vadd.f32 %v2368_v2, %v2984_v37  ;;  %2491 = vmatprep.mubr.msk.bf16.mxu1 %vm1179_vm3, %v1127_v0  ;;  %v1024_v10 = vmax.f32 %v670_v3, 0.0 }
 0x137   :  { %v672_v6 = vpop.f32.mrf.mxu0  ;;  %2492 = vmatmul.mubr.msk.bf16.gmra.mxu1 %vm1179_vm3, %v1128_v1 }
 0x138   :  { %v673_v7 = vadd.f32 %v2984_v37, %v672_v6  ;;  %v1027_v8 = vmax.f32 %v681_v4, 0.0 }
 0x139   :  { %v2371_v9 = vpop.f32.mrf.mxu0 }
 0x13a   :  { %v1025_v11 = vmax.f32 %v673_v7, 0.0  ;;  %v1130_v15 = vpack.c.bf16 %v1027_v8, %v1026_v12  ;;  %v694_v19 = vadd.f32 %v2371_v9, %v2984_v37 }
 0x13b   :  { %v685_v13 = vpop.f32.mrf.mxu0 }
 0x13c   :  { %v1129_v14 = vpack.c.bf16 %v1025_v11, %v1024_v10  ;;  %v686_v17 = vadd.f32 %v2984_v37, %v685_v13  ;;  %v1030_v26 = vmax.f32 %v694_v19, 0.0 }
 0x13d   :  { %v2372_v16 = vpop.f32.mrf.mxu0 }
 0x13e   :  { %v697_v18 = vadd.f32 %v2372_v16, %v2984_v37  ;;  %2495 = vmatprep.mubr.msk.bf16.mxu1 %vm1179_vm3, %v1129_v14  ;;  %v1028_v24 = vmax.f32 %v686_v17, 0.0 }
 0x13f   :  { %v688_v20 = vpop.f32.mrf.mxu0  ;;  %2496 = vmatmul.mubr.msk.bf16.gmra.mxu1 %vm1179_vm3, %v1130_v15 }
 0x140   :  { %v689_v21 = vadd.f32 %v2984_v37, %v688_v20  ;;  %v1031_v22 = vmax.f32 %v697_v18, 0.0 }
 0x141   :  { %v2375_v23 = vpop.f32.mrf.mxu0 }
 0x142   :  { %v1029_v25 = vmax.f32 %v689_v21, 0.0  ;;  %v1132_v29 = vpack.c.bf16 %v1031_v22, %v1030_v26  ;;  %v710_v33 = vadd.f32 %v2375_v23, %v2984_v37 }
 0x143   :  { %v701_v27 = vpop.f32.mrf.mxu0 }
 0x144   :  { %v1131_v28 = vpack.c.bf16 %v1029_v25, %v1028_v24  ;;  %v702_v31 = vadd.f32 %v2984_v37, %v701_v27  ;;  %v1034_v41 = vmax.f32 %v710_v33, 0.0 }
 0x145   :  { %v2376_v30 = vpop.f32.mrf.mxu0 }
 0x146   :  { %v713_v32 = vadd.f32 %v2376_v30, %v2984_v37  ;;  %2499 = vmatprep.mubr.msk.bf16.mxu1 %vm1179_vm3, %v1131_v28  ;;  %v1032_v39 = vmax.f32 %v702_v31, 0.0 }
 0x147   :  { %v704_v34 = vpop.f32.mrf.mxu0  ;;  %2500 = vmatmul.mubr.msk.bf16.gmra.mxu1 %vm1179_vm3, %v1132_v29 }
 0x148   :  { %v705_v35 = vadd.f32 %v2984_v37, %v704_v34  ;;  %v1035_v36 = vmax.f32 %v713_v32, 0.0 }
 0x149   :  { %v2379_v38 = vpop.f32.mrf.mxu0 }
 0x14a   :  { %v1033_v40 = vmax.f32 %v705_v35, 0.0  ;;  %v1134_v44 = vpack.c.bf16 %v1035_v36, %v1034_v41  ;;  %v726_v48 = vadd.f32 %v2379_v38, %v2984_v37 }
 0x14b   :  { %v717_v42 = vpop.f32.mrf.mxu0 }
 0x14c   :  { %v1133_v43 = vpack.c.bf16 %v1033_v40, %v1032_v39  ;;  %v718_v46 = vadd.f32 %v2984_v37, %v717_v42  ;;  %v1038_v55 = vmax.f32 %v726_v48, 0.0 }
 0x14d   :  { %v2380_v45 = vpop.f32.mrf.mxu0 }
 0x14e   :  { %v729_v47 = vadd.f32 %v2380_v45, %v2984_v37  ;;  %2503 = vmatprep.mubr.msk.bf16.mxu1 %vm1179_vm3, %v1133_v43  ;;  %v1036_v53 = vmax.f32 %v718_v46, 0.0 }
 0x14f   :  { %v720_v49 = vpop.f32.mrf.mxu0  ;;  %2504 = vmatmul.mubr.msk.bf16.gmra.mxu1 %vm1179_vm3, %v1134_v44 }
 0x150   :  { %v721_v50 = vadd.f32 %v2984_v37, %v720_v49  ;;  %v1039_v51 = vmax.f32 %v729_v47, 0.0 }
 0x151   :  { %v2383_v52 = vpop.f32.mrf.mxu0 }
 0x152   :  { %v1037_v54 = vmax.f32 %v721_v50, 0.0  ;;  %v1136_v58 = vpack.c.bf16 %v1039_v51, %v1038_v55  ;;  %v742_v62 = vadd.f32 %v2383_v52, %v2984_v37 }
 0x153   :  { %v733_v56 = vpop.f32.mrf.mxu0 }
 0x154   :  { %v1135_v57 = vpack.c.bf16 %v1037_v54, %v1036_v53  ;;  %v734_v60 = vadd.f32 %v2984_v37, %v733_v56  ;;  %v1042_v5 = vmax.f32 %v742_v62, 0.0 }
 0x155   :  { %v2384_v59 = vpop.f32.mrf.mxu0 }
 0x156   :  { %v745_v61 = vadd.f32 %v2384_v59, %v2984_v37  ;;  %2507 = vmatprep.mubr.msk.bf16.mxu1 %vm1179_vm3, %v1135_v57  ;;  %v1040_v3 = vmax.f32 %v734_v60, 0.0 }
 0x157   :  { %v736_v63 = vpop.f32.mrf.mxu0  ;;  %2508 = vmatmul.mubr.msk.bf16.gmra.mxu1 %vm1179_vm3, %v1136_v58 }
 0x158   :  { %v737_v0 = vadd.f32 %v2984_v37, %v736_v63  ;;  %v1043_v1 = vmax.f32 %v745_v61, 0.0 }
 0x159   :  { %v2387_v2 = vpop.f32.mrf.mxu0 }
 0x15a   :  { %v1041_v4 = vmax.f32 %v737_v0, 0.0  ;;  %v1138_v8 = vpack.c.bf16 %v1043_v1, %v1042_v5  ;;  %v758_v12 = vadd.f32 %v2387_v2, %v2984_v37 }
 0x15b   :  { %v749_v6 = vpop.f32.mrf.mxu0 }
 0x15c   :  { %v1137_v7 = vpack.c.bf16 %v1041_v4, %v1040_v3  ;;  %v750_v10 = vadd.f32 %v2984_v37, %v749_v6  ;;  %v1046_v19 = vmax.f32 %v758_v12, 0.0 }
 0x15d   :  { %v2388_v9 = vpop.f32.mrf.mxu0 }
 0x15e   :  { %v761_v11 = vadd.f32 %v2388_v9, %v2984_v37  ;;  %2511 = vmatprep.mubr.msk.bf16.mxu1 %vm1179_vm3, %v1137_v7  ;;  %v1044_v17 = vmax.f32 %v750_v10, 0.0 }
 0x15f   :  { %v752_v13 = vpop.f32.mrf.mxu0  ;;  %2512 = vmatmul.mubr.msk.bf16.gmra.mxu1 %vm1179_vm3, %v1138_v8 }
 0x160   :  { %v753_v14 = vadd.f32 %v2984_v37, %v752_v13  ;;  %v1047_v15 = vmax.f32 %v761_v11, 0.0 }
 0x161   :  { %v2391_v16 = vpop.f32.mrf.mxu0 }
 0x162   :  { %v1045_v18 = vmax.f32 %v753_v14, 0.0  ;;  %v1140_v22 = vpack.c.bf16 %v1047_v15, %v1046_v19  ;;  %v774_v26 = vadd.f32 %v2391_v16, %v2984_v37 }
 0x163   :  { %v765_v20 = vpop.f32.mrf.mxu0 }
 0x164   :  { %v1139_v21 = vpack.c.bf16 %v1045_v18, %v1044_v17  ;;  %v766_v24 = vadd.f32 %v2984_v37, %v765_v20  ;;  %v1050_v33 = vmax.f32 %v774_v26, 0.0 }
 0x165   :  { %v2392_v23 = vpop.f32.mrf.mxu0 }
 0x166   :  { %v777_v25 = vadd.f32 %v2392_v23, %v2984_v37  ;;  %2515 = vmatprep.mubr.msk.bf16.mxu1 %vm1179_vm3, %v1139_v21  ;;  %v1048_v31 = vmax.f32 %v766_v24, 0.0 }
 0x167   :  { %v768_v27 = vpop.f32.mrf.mxu0  ;;  %2516 = vmatmul.mubr.msk.bf16.gmra.mxu1 %vm1179_vm3, %v1140_v22 }
 0x168   :  { %v769_v28 = vadd.f32 %v2984_v37, %v768_v27  ;;  %v1051_v29 = vmax.f32 %v777_v25, 0.0 }
 0x169   :  { %v2395_v30 = vpop.f32.mrf.mxu0 }
 0x16a   :  { %v1049_v32 = vmax.f32 %v769_v28, 0.0  ;;  %v1142_v36 = vpack.c.bf16 %v1051_v29, %v1050_v33  ;;  %v790_v41 = vadd.f32 %v2395_v30, %v2984_v37 }
 0x16b   :  { %v781_v34 = vpop.f32.mrf.mxu0 }
 0x16c   :  { %v1141_v35 = vpack.c.bf16 %v1049_v32, %v1048_v31  ;;  %v782_v39 = vadd.f32 %v2984_v37, %v781_v34  ;;  %v1054_v48 = vmax.f32 %v790_v41, 0.0 }
 0x16d   :  { %v2396_v38 = vpop.f32.mrf.mxu0 }
 0x16e   :  { %v793_v40 = vadd.f32 %v2396_v38, %v2984_v37  ;;  %2519 = vmatprep.mubr.msk.bf16.mxu1 %vm1179_vm3, %v1141_v35  ;;  %v1052_v46 = vmax.f32 %v782_v39, 0.0 }
 0x16f   :  { %v784_v42 = vpop.f32.mrf.mxu0  ;;  %2520 = vmatmul.mubr.msk.bf16.gmra.mxu1 %vm1179_vm3, %v1142_v36 }
 0x170   :  { %v785_v43 = vadd.f32 %v2984_v37, %v784_v42  ;;  %v1055_v44 = vmax.f32 %v793_v40, 0.0 }
 0x171   :  { %v2399_v45 = vpop.f32.mrf.mxu0 }
 0x172   :  { %v1053_v47 = vmax.f32 %v785_v43, 0.0  ;;  %v1144_v51 = vpack.c.bf16 %v1055_v44, %v1054_v48  ;;  %v806_v55 = vadd.f32 %v2399_v45, %v2984_v37 }
 0x173   :  { %v797_v49 = vpop.f32.mrf.mxu0 }
 0x174   :  { %v1143_v50 = vpack.c.bf16 %v1053_v47, %v1052_v46  ;;  %v798_v53 = vadd.f32 %v2984_v37, %v797_v49  ;;  %v1058_v62 = vmax.f32 %v806_v55, 0.0  ;;  %v3216_v46 = vld [vmem:[%s3911_s4] ss:$0 sm:$0xff] }
 0x175   :  { %v2400_v52 = vpop.f32.mrf.mxu0 }
 0x176   :  { %v809_v54 = vadd.f32 %v2400_v52, %v2984_v37  ;;  %2523 = vmatprep.mubr.msk.bf16.mxu1 %vm1179_vm3, %v1143_v50  ;;  %v1056_v60 = vmax.f32 %v798_v53, 0.0 }
 0x177   :  { %v800_v56 = vpop.f32.mrf.mxu0  ;;  %2524 = vmatmul.mubr.msk.bf16.gmra.mxu1 %vm1179_vm3, %v1144_v51 }
 0x178   :  { %v801_v57 = vadd.f32 %v2984_v37, %v800_v56  ;;  %v1059_v58 = vmax.f32 %v809_v54, 0.0 }
 0x179   :  { %v2403_v59 = vpop.f32.mrf.mxu0 }
 0x17a   :  { %v1057_v61 = vmax.f32 %v801_v57, 0.0  ;;  %v1146_v1 = vpack.c.bf16 %v1059_v58, %v1058_v62  ;;  %v822_v5 = vadd.f32 %v2403_v59, %v2984_v37 }
 0x17b   :  { %v813_v63 = vpop.f32.mrf.mxu0 }
 0x17c   :  { %v1145_v0 = vpack.c.bf16 %v1057_v61, %v1056_v60  ;;  %v814_v3 = vadd.f32 %v2984_v37, %v813_v63  ;;  %v1062_v12 = vmax.f32 %v822_v5, 0.0 }
 0x17d   :  { %v2404_v2 = vpop.f32.mrf.mxu0 }
 0x17e   :  { %v825_v4 = vadd.f32 %v2404_v2, %v2984_v37  ;;  %2527 = vmatprep.mubr.msk.bf16.mxu1 %vm1179_vm3, %v1145_v0  ;;  %v1060_v10 = vmax.f32 %v814_v3, 0.0 }
 0x17f   :  { %v816_v6 = vpop.f32.mrf.mxu0  ;;  %2528 = vmatmul.mubr.msk.bf16.gmra.mxu1 %vm1179_vm3, %v1146_v1 }
 0x180   :  { %v817_v7 = vadd.f32 %v2984_v37, %v816_v6  ;;  %v1063_v8 = vmax.f32 %v825_v4, 0.0 }
 0x181   :  { %v2407_v9 = vpop.f32.mrf.mxu0 }
 0x182   :  { %v1061_v11 = vmax.f32 %v817_v7, 0.0  ;;  %v1148_v15 = vpack.c.bf16 %v1063_v8, %v1062_v12  ;;  %v838_v19 = vadd.f32 %v2407_v9, %v2984_v37 }
 0x183   :  { %v829_v13 = vpop.f32.mrf.mxu0 }
 0x184   :  { %v1147_v14 = vpack.c.bf16 %v1061_v11, %v1060_v10  ;;  %v830_v17 = vadd.f32 %v2984_v37, %v829_v13  ;;  %v1066_v26 = vmax.f32 %v838_v19, 0.0 }
 0x185   :  { %v2408_v16 = vpop.f32.mrf.mxu0 }
 0x186   :  { %v841_v18 = vadd.f32 %v2408_v16, %v2984_v37  ;;  %2531 = vmatprep.mubr.msk.bf16.mxu1 %vm1179_vm3, %v1147_v14  ;;  %v1064_v24 = vmax.f32 %v830_v17, 0.0 }
 0x187   :  { %v832_v20 = vpop.f32.mrf.mxu0  ;;  %2532 = vmatmul.mubr.msk.bf16.gmra.mxu1 %vm1179_vm3, %v1148_v15 }
 0x188   :  { %v833_v21 = vadd.f32 %v2984_v37, %v832_v20  ;;  %v1067_v22 = vmax.f32 %v841_v18, 0.0 }
 0x189   :  { %v2411_v23 = vpop.f32.mrf.mxu0 }
 0x18a   :  { %v1065_v25 = vmax.f32 %v833_v21, 0.0  ;;  %v1150_v29 = vpack.c.bf16 %v1067_v22, %v1066_v26  ;;  %v854_v33 = vadd.f32 %v2411_v23, %v2984_v37 }
 0x18b   :  { %v845_v27 = vpop.f32.mrf.mxu0 }
 0x18c   :  { %v1149_v28 = vpack.c.bf16 %v1065_v25, %v1064_v24  ;;  %v846_v31 = vadd.f32 %v2984_v37, %v845_v27  ;;  %v1070_v41 = vmax.f32 %v854_v33, 0.0 }
 0x18d   :  { %v2412_v30 = vpop.f32.mrf.mxu0 }
 0x18e   :  { %v857_v32 = vadd.f32 %v2412_v30, %v2984_v37  ;;  %2535 = vmatprep.mubr.msk.bf16.mxu1 %vm1179_vm3, %v1149_v28  ;;  %v1068_v39 = vmax.f32 %v846_v31, 0.0 }
 0x18f   :  { %v848_v34 = vpop.f32.mrf.mxu0  ;;  %2536 = vmatmul.mubr.msk.bf16.gmra.mxu1 %vm1179_vm3, %v1150_v29 }
 0x190   :  { %v849_v35 = vadd.f32 %v2984_v37, %v848_v34  ;;  %v1071_v36 = vmax.f32 %v857_v32, 0.0  ;;  %v3278_v32 = vld [vmem:[%s3910_s2] ss:$0 sm:$0xff] }
 0x191   :  { %v2415_v38 = vpop.f32.mrf.mxu0 }
 0x192   :  { %v1069_v40 = vmax.f32 %v849_v35, 0.0  ;;  %v1152_v44 = vpack.c.bf16 %v1071_v36, %v1070_v41  ;;  %v870_v49 = vadd.f32 %v2415_v38, %v2984_v37 }
 0x193   :  { %v861_v42 = vpop.f32.mrf.mxu0 }
 0x194   :  { %v1151_v43 = vpack.c.bf16 %v1069_v40, %v1068_v39  ;;  %v862_v47 = vadd.f32 %v2984_v37, %v861_v42  ;;  %v1074_v60 = vmax.f32 %v870_v49, 0.0 }
 0x195   :  { %v2416_v45 = vpop.f32.mrf.mxu0 }
 0x196   :  { %v873_v48 = vadd.f32 %v2416_v45, %v2984_v37  ;;  %2539 = vmatprep.mubr.msk.bf16.mxu1 %vm1179_vm3, %v1151_v43  ;;  %v1072_v57 = vmax.f32 %v862_v47, 0.0 }
 0x197   :  { %v864_v50 = vpop.f32.mrf.mxu0  ;;  %v2445_v51 = vpop.f32.mrf.mxu1  ;;  %2540 = vmatmul.mubr.msk.bf16.gmra.mxu1 %vm1179_vm3, %v1152_v44 }
 0x198   :  { %v865_v52 = vadd.f32 %v2984_v37, %v864_v50  ;;  %v1415_v53 = vadd.f32 %v2445_v51, %v3216_v46  ;;  %v1075_v54 = vmax.f32 %v873_v48, 0.0 }
 0x199   :  { %v2419_v55 = vpop.f32.mrf.mxu0  ;;  %v1406_v56 = vpop.f32.mrf.mxu1 }
 0x19a   :  { %v1073_v58 = vmax.f32 %v865_v52, 0.0  ;;  %1919 = vst.msk [vmem:[%s3912_s5 + $0x10] sm:$0xff] %vm1179_vm3, %v1415_v53  ;;  %v1407_v59 = vadd.f32 %v3216_v46, %v1406_v56  ;;  %v1154_v1 = vpack.c.bf16 %v1075_v54, %v1074_v60  ;;  %v886_v7 = vadd.f32 %v2419_v55, %v2984_v37 }
 0x19b   :  { %v877_v61 = vpop.f32.mrf.mxu0  ;;  %v2446_v62 = vpop.f32.mrf.mxu1 }
 0x19c   :  { %v1153_v63 = vpack.c.bf16 %v1073_v58, %v1072_v57  ;;  %1917 = vst.msk [vmem:[%s3912_s5] sm:$0xff] %vm1179_vm3, %v1407_v59  ;;  %v1418_v0 = vadd.f32 %v2446_v62, %v3216_v46  ;;  %v878_v4 = vadd.f32 %v2984_v37, %v877_v61  ;;  %v1078_v18 = vmax.f32 %v886_v7, 0.0 }
 0x19d   :  { %v2420_v2 = vpop.f32.mrf.mxu0  ;;  %v1409_v3 = vpop.f32.mrf.mxu1 }
 0x19e   :  { %1920 = vst.msk [vmem:[%s3912_s5 + $0x18] sm:$0xff] %vm1179_vm3, %v1418_v0  ;;  %v889_v5 = vadd.f32 %v2420_v2, %v2984_v37  ;;  %v1410_v6 = vadd.f32 %v3216_v46, %v1409_v3  ;;  %2543 = vmatprep.mubr.msk.bf16.mxu1 %vm1179_vm3, %v1153_v63  ;;  %v1076_v15 = vmax.f32 %v878_v4, 0.0 }
 0x19f   :  { %v880_v8 = vpop.f32.mrf.mxu0  ;;  %v2449_v9 = vpop.f32.mrf.mxu1  ;;  %2544 = vmatmul.mubr.msk.bf16.gmra.mxu1 %vm1179_vm3, %v1154_v1 }
 0x1a0   :  { %1918 = vst.msk [vmem:[%s3912_s5 + $0x8] sm:$0xff] %vm1179_vm3, %v1410_v6  ;;  %v881_v10 = vadd.f32 %v2984_v37, %v880_v8  ;;  %v1431_v11 = vadd.f32 %v2449_v9, %v3216_v46  ;;  %v1079_v12 = vmax.f32 %v889_v5, 0.0 }
 0x1a1   :  { %v2423_v13 = vpop.f32.mrf.mxu0  ;;  %v1422_v14 = vpop.f32.mrf.mxu1 }
 0x1a2   :  { %v1077_v16 = vmax.f32 %v881_v10, 0.0  ;;  %1923 = vst.msk [vmem:[%s3912_s5 + $0x30] sm:$0xff] %vm1179_vm3, %v1431_v11  ;;  %v1423_v17 = vadd.f32 %v3216_v46, %v1422_v14  ;;  %v1156_v23 = vpack.c.bf16 %v1079_v12, %v1078_v18  ;;  %v902_v29 = vadd.f32 %v2423_v13, %v2984_v37 }
 0x1a3   :  { %v893_v19 = vpop.f32.mrf.mxu0  ;;  %v2450_v20 = vpop.f32.mrf.mxu1 }
 0x1a4   :  { %v1155_v21 = vpack.c.bf16 %v1077_v16, %v1076_v15  ;;  %1921 = vst.msk [vmem:[%s3912_s5 + $0x20] sm:$0xff] %vm1179_vm3, %v1423_v17  ;;  %v1434_v22 = vadd.f32 %v2450_v20, %v3216_v46  ;;  %v894_v26 = vadd.f32 %v2984_v37, %v893_v19  ;;  %v1082_v41 = vmax.f32 %v902_v29, 0.0 }
 0x1a5   :  { %v2424_v24 = vpop.f32.mrf.mxu0  ;;  %v1425_v25 = vpop.f32.mrf.mxu1 }
 0x1a6   :  { %1924 = vst.msk [vmem:[%s3912_s5 + $0x38] sm:$0xff] %vm1179_vm3, %v1434_v22  ;;  %v905_v27 = vadd.f32 %v2424_v24, %v2984_v37  ;;  %v1426_v28 = vadd.f32 %v3216_v46, %v1425_v25  ;;  %2547 = vmatprep.mubr.msk.bf16.mxu1 %vm1179_vm3, %v1155_v21  ;;  %v1080_v38 = vmax.f32 %v894_v26, 0.0 }
 0x1a7   :  { %v896_v30 = vpop.f32.mrf.mxu0  ;;  %v2453_v31 = vpop.f32.mrf.mxu1  ;;  %2548 = vmatmul.mubr.msk.bf16.gmra.mxu1 %vm1179_vm3, %v1156_v23 }
 0x1a8   :  { %1922 = vst.msk [vmem:[%s3912_s5 + $0x28] sm:$0xff] %vm1179_vm3, %v1426_v28  ;;  %v897_v33 = vadd.f32 %v3278_v32, %v896_v30  ;;  %v1447_v34 = vadd.f32 %v2453_v31, %v3216_v46  ;;  %v1083_v35 = vmax.f32 %v905_v27, 0.0 }
 0x1a9   :  { %v2427_v37 = vpop.f32.mrf.mxu0  ;;  %v1438_v36 = vpop.f32.mrf.mxu1 }
 0x1aa   :  { %v1081_v39 = vmax.f32 %v897_v33, 0.0  ;;  %1927 = vst.msk [vmem:[%s3912_s5 + $0x50] sm:$0xff] %vm1179_vm3, %v1447_v34  ;;  %v1439_v40 = vadd.f32 %v3216_v46, %v1438_v36  ;;  %v1158_v47 = vpack.c.bf16 %v1083_v35, %v1082_v41  ;;  %v918_v53 = vadd.f32 %v3278_v32, %v2427_v37 }
 0x1ab   :  { %v909_v42 = vpop.f32.mrf.mxu0  ;;  %v2454_v43 = vpop.f32.mrf.mxu1 }
 0x1ac   :  { %v1157_v44 = vpack.c.bf16 %v1081_v39, %v1080_v38  ;;  %1925 = vst.msk [vmem:[%s3912_s5 + $0x40] sm:$0xff] %vm1179_vm3, %v1439_v40  ;;  %v1450_v45 = vadd.f32 %v2454_v43, %v3216_v46  ;;  %v910_v50 = vadd.f32 %v3278_v32, %v909_v42  ;;  %v1086_v0 = vmax.f32 %v918_v53, 0.0 }
 0x1ad   :  { %v2428_v48 = vpop.f32.mrf.mxu0  ;;  %v1441_v49 = vpop.f32.mrf.mxu1 }
 0x1ae   :  { %1928 = vst.msk [vmem:[%s3912_s5 + $0x58] sm:$0xff] %vm1179_vm3, %v1450_v45  ;;  %v921_v51 = vadd.f32 %v3278_v32, %v2428_v48  ;;  %v1442_v52 = vadd.f32 %v3216_v46, %v1441_v49  ;;  %2551 = vmatprep.mubr.msk.bf16.mxu1 %vm1179_vm3, %v1157_v44  ;;  %v1084_v61 = vmax.f32 %v910_v50, 0.0 }
 0x1af   :  { %v912_v54 = vpop.f32.mrf.mxu0  ;;  %v2457_v55 = vpop.f32.mrf.mxu1  ;;  %2552 = vmatmul.mubr.msk.bf16.gmra.mxu1 %vm1179_vm3, %v1158_v47 }
 0x1b0   :  { %1926 = vst.msk [vmem:[%s3912_s5 + $0x48] sm:$0xff] %vm1179_vm3, %v1442_v52  ;;  %v913_v56 = vadd.f32 %v3278_v32, %v912_v54  ;;  %v1463_v57 = vadd.f32 %v2457_v55, %v3216_v46  ;;  %v1087_v58 = vmax.f32 %v921_v51, 0.0 }
 0x1b1   :  { %v2431_v59 = vpop.f32.mrf.mxu0  ;;  %v1454_v60 = vpop.f32.mrf.mxu1 }
 0x1b2   :  { %v1085_v62 = vmax.f32 %v913_v56, 0.0  ;;  %1931 = vst.msk [vmem:[%s3912_s5 + $0x70] sm:$0xff] %vm1179_vm3, %v1463_v57  ;;  %v1455_v63 = vadd.f32 %v3216_v46, %v1454_v60  ;;  %v1160_v5 = vpack.c.bf16 %v1087_v58, %v1086_v0  ;;  %v934_v11 = vadd.f32 %v3278_v32, %v2431_v59 }
 0x1b3   :  { %v925_v1 = vpop.f32.mrf.mxu0  ;;  %v2458_v2 = vpop.f32.mrf.mxu1 }
 0x1b4   :  { %v1159_v3 = vpack.c.bf16 %v1085_v62, %v1084_v61  ;;  %1929 = vst.msk [vmem:[%s3912_s5 + $0x60] sm:$0xff] %vm1179_vm3, %v1455_v63  ;;  %v1466_v4 = vadd.f32 %v2458_v2, %v3216_v46  ;;  %v926_v8 = vadd.f32 %v3278_v32, %v925_v1  ;;  %v1090_v22 = vmax.f32 %v934_v11, 0.0 }
 0x1b5   :  { %v2432_v6 = vpop.f32.mrf.mxu0  ;;  %v1457_v7 = vpop.f32.mrf.mxu1 }
 0x1b6   :  { %1932 = vst.msk [vmem:[%s3912_s5 + $0x78] sm:$0xff] %vm1179_vm3, %v1466_v4  ;;  %v937_v9 = vadd.f32 %v3278_v32, %v2432_v6  ;;  %v1458_v10 = vadd.f32 %v3216_v46, %v1457_v7  ;;  %2555 = vmatprep.mubr.msk.bf16.mxu1 %vm1179_vm3, %v1159_v3  ;;  %v1088_v19 = vmax.f32 %v926_v8, 0.0 }
 0x1b7   :  { %v928_v12 = vpop.f32.mrf.mxu0  ;;  %v2461_v13 = vpop.f32.mrf.mxu1  ;;  %2556 = vmatmul.mubr.msk.bf16.gmra.mxu1 %vm1179_vm3, %v1160_v5 }
 0x1b8   :  { %1930 = vst.msk [vmem:[%s3912_s5 + $0x68] sm:$0xff] %vm1179_vm3, %v1458_v10  ;;  %v929_v14 = vadd.f32 %v3278_v32, %v928_v12  ;;  %v1479_v15 = vadd.f32 %v2461_v13, %v3216_v46  ;;  %v1091_v16 = vmax.f32 %v937_v9, 0.0 }
 0x1b9   :  { %v2435_v17 = vpop.f32.mrf.mxu0  ;;  %v1470_v18 = vpop.f32.mrf.mxu1 }
 0x1ba   :  { %v1089_v20 = vmax.f32 %v929_v14, 0.0  ;;  %1935 = vst.msk [vmem:[%s3912_s5 + $0x90] sm:$0xff] %vm1179_vm3, %v1479_v15  ;;  %v1471_v21 = vadd.f32 %v3216_v46, %v1470_v18  ;;  %v1162_v27 = vpack.c.bf16 %v1091_v16, %v1090_v22  ;;  %v950_v34 = vadd.f32 %v3278_v32, %v2435_v17 }
 0x1bb   :  { %v941_v23 = vpop.f32.mrf.mxu0  ;;  %v2462_v24 = vpop.f32.mrf.mxu1 }
 0x1bc   :  { %v1161_v25 = vpack.c.bf16 %v1089_v20, %v1088_v19  ;;  %1933 = vst.msk [vmem:[%s3912_s5 + $0x80] sm:$0xff] %vm1179_vm3, %v1471_v21  ;;  %v1482_v26 = vadd.f32 %v2462_v24, %v3216_v46  ;;  %v942_v30 = vadd.f32 %v3278_v32, %v941_v23  ;;  %v1094_v45 = vmax.f32 %v950_v34, 0.0 }
 0x1bd   :  { %v2436_v28 = vpop.f32.mrf.mxu0  ;;  %v1473_v29 = vpop.f32.mrf.mxu1 }
 0x1be   :  { %1936 = vst.msk [vmem:[%s3912_s5 + $0x98] sm:$0xff] %vm1179_vm3, %v1482_v26  ;;  %v953_v31 = vadd.f32 %v3278_v32, %v2436_v28  ;;  %v1474_v33 = vadd.f32 %v3216_v46, %v1473_v29  ;;  %2559 = vmatprep.mubr.msk.bf16.mxu1 %vm1179_vm3, %v1161_v25  ;;  %v1092_v42 = vmax.f32 %v942_v30, 0.0 }
 0x1bf   :  { %v944_v35 = vpop.f32.mrf.mxu0  ;;  %v2465_v37 = vpop.f32.mrf.mxu1  ;;  %2560 = vmatmul.mubr.msk.bf16.gmra.mxu1 %vm1179_vm3, %v1162_v27 }
 0x1c0   :  { %1934 = vst.msk [vmem:[%s3912_s5 + $0x88] sm:$0xff] %vm1179_vm3, %v1474_v33  ;;  %v945_v36 = vadd.f32 %v3278_v32, %v944_v35  ;;  %v1495_v38 = vadd.f32 %v2465_v37, %v3216_v46  ;;  %v1095_v39 = vmax.f32 %v953_v31, 0.0 }
 0x1c1   :  { %v2439_v40 = vpop.f32.mrf.mxu0  ;;  %v1486_v41 = vpop.f32.mrf.mxu1 }
 0x1c2   :  { %v1093_v43 = vmax.f32 %v945_v36, 0.0  ;;  %1939 = vst.msk [vmem:[%s3912_s5 + $0xb0] sm:$0xff] %vm1179_vm3, %v1495_v38  ;;  %v1487_v44 = vadd.f32 %v3216_v46, %v1486_v41  ;;  %v1164_v51 = vpack.c.bf16 %v1095_v39, %v1094_v45  ;;  %v966_v57 = vadd.f32 %v3278_v32, %v2439_v40 }
 0x1c3   :  { %v957_v47 = vpop.f32.mrf.mxu0  ;;  %v2466_v48 = vpop.f32.mrf.mxu1 }
 0x1c4   :  { %v1163_v49 = vpack.c.bf16 %v1093_v43, %v1092_v42  ;;  %1937 = vst.msk [vmem:[%s3912_s5 + $0xa0] sm:$0xff] %vm1179_vm3, %v1487_v44  ;;  %v1498_v50 = vadd.f32 %v2466_v48, %v3216_v46  ;;  %v958_v54 = vadd.f32 %v3278_v32, %v957_v47  ;;  %v1098_v3 = vmax.f32 %v966_v57, 0.0 }
 0x1c5   :  { %v2440_v52 = vpop.f32.mrf.mxu0  ;;  %v1489_v53 = vpop.f32.mrf.mxu1 }
 0x1c6   :  { %1940 = vst.msk [vmem:[%s3912_s5 + $0xb8] sm:$0xff] %vm1179_vm3, %v1498_v50  ;;  %v969_v55 = vadd.f32 %v3278_v32, %v2440_v52  ;;  %v1490_v56 = vadd.f32 %v3216_v46, %v1489_v53  ;;  %2563 = vmatprep.mubr.msk.bf16.mxu1 %vm1179_vm3, %v1163_v49  ;;  %v1096_v0 = vmax.f32 %v958_v54, 0.0 }
 0x1c7   :  { %v960_v58 = vpop.f32.mrf.mxu0  ;;  %v2469_v59 = vpop.f32.mrf.mxu1  ;;  %2564 = vmatmul.mubr.msk.bf16.gmra.mxu1 %vm1179_vm3, %v1164_v51 }
 0x1c8   :  { %1938 = vst.msk [vmem:[%s3912_s5 + $0xa8] sm:$0xff] %vm1179_vm3, %v1490_v56  ;;  %v961_v60 = vadd.f32 %v3278_v32, %v960_v58  ;;  %v1511_v61 = vadd.f32 %v2469_v59, %v3216_v46  ;;  %v1099_v62 = vmax.f32 %v969_v55, 0.0 }
 0x1c9   :  { %v1502_v63 = vpop.f32.mrf.mxu1 }
 0x1ca   :  { %v1097_v1 = vmax.f32 %v961_v60, 0.0  ;;  %1943 = vst.msk [vmem:[%s3912_s5 + $0xd0] sm:$0xff] %vm1179_vm3, %v1511_v61  ;;  %v1503_v2 = vadd.f32 %v3216_v46, %v1502_v63  ;;  %v1166_v6 = vpack.c.bf16 %v1099_v62, %v1098_v3 }
 0x1cb   :  { %v2470_v4 = vpop.f32.mrf.mxu1 }
 0x1cc   :  { %v1165_v5 = vpack.c.bf16 %v1097_v1, %v1096_v0  ;;  %1941 = vst.msk [vmem:[%s3912_s5 + $0xc0] sm:$0xff] %vm1179_vm3, %v1503_v2  ;;  %v1514_v32 = vadd.f32 %v2470_v4, %v3216_v46 }
 0x1cd   :  { %v1505_v7 = vpop.f32.mrf.mxu1 }
 0x1ce   :  { %1944 = vst.msk [vmem:[%s3912_s5 + $0xd8] sm:$0xff] %vm1179_vm3, %v1514_v32  ;;  %v1506_v8 = vadd.f32 %v3216_v46, %v1505_v7  ;;  %2567 = vmatprep.mubr.msk.bf16.mxu1 %vm1179_vm3, %v1165_v5 }
 0x1cf   :  { %v2473_v9 = vpop.f32.mrf.mxu1  ;;  %2568 = vmatmul.mubr.msk.bf16.gmra.mxu1 %vm1179_vm3, %v1166_v6 }
 0x1d0   :  { %1942 = vst.msk [vmem:[%s3912_s5 + $0xc8] sm:$0xff] %vm1179_vm3, %v1506_v8  ;;  %v1527_v10 = vadd.f32 %v2473_v9, %v3216_v46 }
 0x1d1   :  { %v1518_v11 = vpop.f32.mrf.mxu1 }
 0x1d2   :  { %1947 = vst.msk [vmem:[%s3912_s5 + $0xf0] sm:$0xff] %vm1179_vm3, %v1527_v10  ;;  %v1519_v12 = vadd.f32 %v3216_v46, %v1518_v11 }
 0x1d3   :  { %v2474_v13 = vpop.f32.mrf.mxu1 }
 0x1d4   :  { %1945 = vst.msk [vmem:[%s3912_s5 + $0xe0] sm:$0xff] %vm1179_vm3, %v1519_v12  ;;  %v1530_v14 = vadd.f32 %v2474_v13, %v3216_v46 }
 0x1d5   :  { %v1521_v15 = vpop.f32.mrf.mxu1 }
 0x1d6   :  { %1948 = vst.msk [vmem:[%s3912_s5 + $0xf8] sm:$0xff] %vm1179_vm3, %v1530_v14  ;;  %v1522_v16 = vadd.f32 %v3216_v46, %v1521_v15 }
 0x1d7   :  { %v2477_v17 = vpop.f32.mrf.mxu1 }
 0x1d8   :  { %1946 = vst.msk [vmem:[%s3912_s5 + $0xe8] sm:$0xff] %vm1179_vm3, %v1522_v16  ;;  %v1543_v18 = vadd.f32 %v2477_v17, %v3216_v46 }
 0x1d9   :  { %v1534_v19 = vpop.f32.mrf.mxu1 }
 0x1da   :  { %1951 = vst.msk [vmem:[%s3912_s5 + $0x110] sm:$0xff] %vm1179_vm3, %v1543_v18  ;;  %v1535_v20 = vadd.f32 %v3216_v46, %v1534_v19 }
 0x1db   :  { %v2478_v21 = vpop.f32.mrf.mxu1 }
 0x1dc   :  { %1949 = vst.msk [vmem:[%s3912_s5 + $0x100] sm:$0xff] %vm1179_vm3, %v1535_v20  ;;  %v1546_v22 = vadd.f32 %v2478_v21, %v3216_v46 }
 0x1dd   :  { %v1537_v23 = vpop.f32.mrf.mxu1 }
 0x1de   :  { %1952 = vst.msk [vmem:[%s3912_s5 + $0x118] sm:$0xff] %vm1179_vm3, %v1546_v22  ;;  %v1538_v24 = vadd.f32 %v3216_v46, %v1537_v23 }
 0x1df   :  { %v2481_v25 = vpop.f32.mrf.mxu1 }
 0x1e0   :  { %1950 = vst.msk [vmem:[%s3912_s5 + $0x108] sm:$0xff] %vm1179_vm3, %v1538_v24  ;;  %v1559_v26 = vadd.f32 %v2481_v25, %v3216_v46 }
 0x1e1   :  { %v1550_v27 = vpop.f32.mrf.mxu1 }
 0x1e2   :  { %1955 = vst.msk [vmem:[%s3912_s5 + $0x130] sm:$0xff] %vm1179_vm3, %v1559_v26  ;;  %v1551_v28 = vadd.f32 %v3216_v46, %v1550_v27 }
 0x1e3   :  { %v2482_v29 = vpop.f32.mrf.mxu1 }
 0x1e4   :  { %1953 = vst.msk [vmem:[%s3912_s5 + $0x120] sm:$0xff] %vm1179_vm3, %v1551_v28  ;;  %v1562_v30 = vadd.f32 %v2482_v29, %v3216_v46 }
 0x1e5   :  { %v1553_v31 = vpop.f32.mrf.mxu1 }
 0x1e6   :  { %1956 = vst.msk [vmem:[%s3912_s5 + $0x138] sm:$0xff] %vm1179_vm3, %v1562_v30  ;;  %v1554_v33 = vadd.f32 %v3216_v46, %v1553_v31 }
 0x1e7   :  { %v2485_v34 = vpop.f32.mrf.mxu1 }
 0x1e8   :  { %1954 = vst.msk [vmem:[%s3912_s5 + $0x128] sm:$0xff] %vm1179_vm3, %v1554_v33  ;;  %v1575_v35 = vadd.f32 %v2485_v34, %v3216_v46 }
 0x1e9   :  { %v1566_v37 = vpop.f32.mrf.mxu1 }
 0x1ea   :  { %1959 = vst.msk [vmem:[%s3912_s5 + $0x150] sm:$0xff] %vm1179_vm3, %v1575_v35  ;;  %v1567_v36 = vadd.f32 %v3216_v46, %v1566_v37 }
 0x1eb   :  { %v2486_v38 = vpop.f32.mrf.mxu1 }
 0x1ec   :  { %1957 = vst.msk [vmem:[%s3912_s5 + $0x140] sm:$0xff] %vm1179_vm3, %v1567_v36  ;;  %v1578_v39 = vadd.f32 %v2486_v38, %v3216_v46 }
 0x1ed   :  { %v1569_v40 = vpop.f32.mrf.mxu1 }
 0x1ee   :  { %1960 = vst.msk [vmem:[%s3912_s5 + $0x158] sm:$0xff] %vm1179_vm3, %v1578_v39  ;;  %v1570_v41 = vadd.f32 %v3216_v46, %v1569_v40 }
 0x1ef   :  { %v2489_v42 = vpop.f32.mrf.mxu1 }
 0x1f0   :  { %1958 = vst.msk [vmem:[%s3912_s5 + $0x148] sm:$0xff] %vm1179_vm3, %v1570_v41  ;;  %v1591_v43 = vadd.f32 %v2489_v42, %v3216_v46 }
 0x1f1   :  { %v1582_v44 = vpop.f32.mrf.mxu1 }
 0x1f2   :  { %1963 = vst.msk [vmem:[%s3912_s5 + $0x170] sm:$0xff] %vm1179_vm3, %v1591_v43  ;;  %v1583_v45 = vadd.f32 %v3216_v46, %v1582_v44 }
 0x1f3   :  { %v2490_v47 = vpop.f32.mrf.mxu1 }
 0x1f4   :  { %1961 = vst.msk [vmem:[%s3912_s5 + $0x160] sm:$0xff] %vm1179_vm3, %v1583_v45  ;;  %v1594_v48 = vadd.f32 %v2490_v47, %v3216_v46 }
 0x1f5   :  { %v1585_v49 = vpop.f32.mrf.mxu1 }
 0x1f6   :  { %1964 = vst.msk [vmem:[%s3912_s5 + $0x178] sm:$0xff] %vm1179_vm3, %v1594_v48  ;;  %v1586_v50 = vadd.f32 %v3216_v46, %v1585_v49 }
 0x1f7   :  { %v2493_v51 = vpop.f32.mrf.mxu1 }
 0x1f8   :  { %1962 = vst.msk [vmem:[%s3912_s5 + $0x168] sm:$0xff] %vm1179_vm3, %v1586_v50  ;;  %v1607_v52 = vadd.f32 %v2493_v51, %v3216_v46 }
 0x1f9   :  { %v1598_v53 = vpop.f32.mrf.mxu1 }
 0x1fa   :  { %1967 = vst.msk [vmem:[%s3912_s5 + $0x190] sm:$0xff] %vm1179_vm3, %v1607_v52  ;;  %v1599_v54 = vadd.f32 %v3216_v46, %v1598_v53 }
 0x1fb   :  { %v2494_v55 = vpop.f32.mrf.mxu1 }
 0x1fc   :  { %1965 = vst.msk [vmem:[%s3912_s5 + $0x180] sm:$0xff] %vm1179_vm3, %v1599_v54  ;;  %v1610_v56 = vadd.f32 %v2494_v55, %v3216_v46 }
 0x1fd   :  { %v1601_v57 = vpop.f32.mrf.mxu1 }
 0x1fe   :  { %1968 = vst.msk [vmem:[%s3912_s5 + $0x198] sm:$0xff] %vm1179_vm3, %v1610_v56  ;;  %v1602_v58 = vadd.f32 %v3216_v46, %v1601_v57 }
 0x1ff   :  { %v2497_v59 = vpop.f32.mrf.mxu1 }
 0x200   :  { %1966 = vst.msk [vmem:[%s3912_s5 + $0x188] sm:$0xff] %vm1179_vm3, %v1602_v58  ;;  %v1623_v60 = vadd.f32 %v2497_v59, %v3216_v46 }
 0x201   :  { %v1614_v61 = vpop.f32.mrf.mxu1 }
 0x202   :  { %1971 = vst.msk [vmem:[%s3912_s5 + $0x1b0] sm:$0xff] %vm1179_vm3, %v1623_v60  ;;  %v1615_v62 = vadd.f32 %v3216_v46, %v1614_v61 }
 0x203   :  { %v2498_v63 = vpop.f32.mrf.mxu1 }
 0x204   :  { %1969 = vst.msk [vmem:[%s3912_s5 + $0x1a0] sm:$0xff] %vm1179_vm3, %v1615_v62  ;;  %v1626_v0 = vadd.f32 %v2498_v63, %v3216_v46 }
 0x205   :  { %v1617_v1 = vpop.f32.mrf.mxu1 }
 0x206   :  { %1972 = vst.msk [vmem:[%s3912_s5 + $0x1b8] sm:$0xff] %vm1179_vm3, %v1626_v0  ;;  %v1618_v2 = vadd.f32 %v3216_v46, %v1617_v1 }
 0x207   :  { %v2501_v3 = vpop.f32.mrf.mxu1 }
 0x208   :  { %1970 = vst.msk [vmem:[%s3912_s5 + $0x1a8] sm:$0xff] %vm1179_vm3, %v1618_v2  ;;  %v1639_v4 = vadd.f32 %v2501_v3, %v3216_v46 }
 0x209   :  { %v1630_v5 = vpop.f32.mrf.mxu1 }
 0x20a   :  { %1975 = vst.msk [vmem:[%s3912_s5 + $0x1d0] sm:$0xff] %vm1179_vm3, %v1639_v4  ;;  %v1631_v32 = vadd.f32 %v3216_v46, %v1630_v5 }
 0x20b   :  { %v2502_v6 = vpop.f32.mrf.mxu1 }
 0x20c   :  { %1973 = vst.msk [vmem:[%s3912_s5 + $0x1c0] sm:$0xff] %vm1179_vm3, %v1631_v32  ;;  %v1642_v7 = vadd.f32 %v2502_v6, %v3216_v46 }
 0x20d   :  { %v1633_v8 = vpop.f32.mrf.mxu1 }
 0x20e   :  { %1976 = vst.msk [vmem:[%s3912_s5 + $0x1d8] sm:$0xff] %vm1179_vm3, %v1642_v7  ;;  %v1634_v9 = vadd.f32 %v3216_v46, %v1633_v8 }
 0x20f   :  { %v2505_v10 = vpop.f32.mrf.mxu1 }
 0x210   :  { %1974 = vst.msk [vmem:[%s3912_s5 + $0x1c8] sm:$0xff] %vm1179_vm3, %v1634_v9  ;;  %v1655_v11 = vadd.f32 %v2505_v10, %v3216_v46 }
 0x211   :  { %v1646_v12 = vpop.f32.mrf.mxu1 }
 0x212   :  { %1979 = vst.msk [vmem:[%s3912_s5 + $0x1f0] sm:$0xff] %vm1179_vm3, %v1655_v11  ;;  %v1647_v13 = vadd.f32 %v3216_v46, %v1646_v12 }
 0x213   :  { %v2506_v14 = vpop.f32.mrf.mxu1 }
 0x214   :  { %1977 = vst.msk [vmem:[%s3912_s5 + $0x1e0] sm:$0xff] %vm1179_vm3, %v1647_v13  ;;  %v1658_v15 = vadd.f32 %v2506_v14, %v3216_v46 }
 0x215   :  { %v1649_v16 = vpop.f32.mrf.mxu1 }
 0x216   :  { %1980 = vst.msk [vmem:[%s3912_s5 + $0x1f8] sm:$0xff] %vm1179_vm3, %v1658_v15  ;;  %v1650_v17 = vadd.f32 %v3216_v46, %v1649_v16 }
 0x217   :  { %v2509_v18 = vpop.f32.mrf.mxu1 }
 0x218   :  { %1978 = vst.msk [vmem:[%s3912_s5 + $0x1e8] sm:$0xff] %vm1179_vm3, %v1650_v17  ;;  %v1671_v19 = vadd.f32 %v2509_v18, %v3216_v46 }
 0x219   :  { %v1662_v20 = vpop.f32.mrf.mxu1 }
 0x21a   :  { %1983 = vst.msk [vmem:[%s3912_s5 + $0x210] sm:$0xff] %vm1179_vm3, %v1671_v19  ;;  %v1663_v21 = vadd.f32 %v3216_v46, %v1662_v20 }
 0x21b   :  { %v2510_v22 = vpop.f32.mrf.mxu1 }
 0x21c   :  { %1981 = vst.msk [vmem:[%s3912_s5 + $0x200] sm:$0xff] %vm1179_vm3, %v1663_v21  ;;  %v1674_v23 = vadd.f32 %v2510_v22, %v3216_v46 }
 0x21d   :  { %v1665_v24 = vpop.f32.mrf.mxu1 }
 0x21e   :  { %1984 = vst.msk [vmem:[%s3912_s5 + $0x218] sm:$0xff] %vm1179_vm3, %v1674_v23  ;;  %v1666_v25 = vadd.f32 %v3216_v46, %v1665_v24 }
 0x21f   :  { %v2513_v26 = vpop.f32.mrf.mxu1 }
 0x220   :  { %1982 = vst.msk [vmem:[%s3912_s5 + $0x208] sm:$0xff] %vm1179_vm3, %v1666_v25  ;;  %v1687_v27 = vadd.f32 %v2513_v26, %v3216_v46 }
 0x221   :  { %v1678_v28 = vpop.f32.mrf.mxu1 }
 0x222   :  { %1987 = vst.msk [vmem:[%s3912_s5 + $0x230] sm:$0xff] %vm1179_vm3, %v1687_v27  ;;  %v1679_v29 = vadd.f32 %v3216_v46, %v1678_v28 }
 0x223   :  { %v2514_v30 = vpop.f32.mrf.mxu1 }
 0x224   :  { %1985 = vst.msk [vmem:[%s3912_s5 + $0x220] sm:$0xff] %vm1179_vm3, %v1679_v29  ;;  %v1690_v31 = vadd.f32 %v2514_v30, %v3216_v46 }
 0x225   :  { %v1681_v33 = vpop.f32.mrf.mxu1 }
 0x226   :  { %1988 = vst.msk [vmem:[%s3912_s5 + $0x238] sm:$0xff] %vm1179_vm3, %v1690_v31  ;;  %v1682_v34 = vadd.f32 %v3216_v46, %v1681_v33 }
 0x227   :  { %v2517_v35 = vpop.f32.mrf.mxu1 }
 0x228   :  { %1986 = vst.msk [vmem:[%s3912_s5 + $0x228] sm:$0xff] %vm1179_vm3, %v1682_v34  ;;  %v1703_v37 = vadd.f32 %v2517_v35, %v3216_v46 }
 0x229   :  { %v1694_v36 = vpop.f32.mrf.mxu1 }
 0x22a   :  { %1991 = vst.msk [vmem:[%s3912_s5 + $0x250] sm:$0xff] %vm1179_vm3, %v1703_v37  ;;  %v1695_v38 = vadd.f32 %v3216_v46, %v1694_v36 }
 0x22b   :  { %v2518_v39 = vpop.f32.mrf.mxu1 }
 0x22c   :  { %1989 = vst.msk [vmem:[%s3912_s5 + $0x240] sm:$0xff] %vm1179_vm3, %v1695_v38  ;;  %v1706_v40 = vadd.f32 %v2518_v39, %v3216_v46 }
 0x22d   :  { %v1697_v41 = vpop.f32.mrf.mxu1 }
 0x22e   :  { %1992 = vst.msk [vmem:[%s3912_s5 + $0x258] sm:$0xff] %vm1179_vm3, %v1706_v40  ;;  %v1698_v42 = vadd.f32 %v3216_v46, %v1697_v41 }
 0x22f   :  { %v2521_v43 = vpop.f32.mrf.mxu1 }
 0x230   :  { %1990 = vst.msk [vmem:[%s3912_s5 + $0x248] sm:$0xff] %vm1179_vm3, %v1698_v42  ;;  %v1719_v44 = vadd.f32 %v2521_v43, %v3216_v46 }
 0x231   :  { %v1710_v45 = vpop.f32.mrf.mxu1 }
 0x232   :  { %1995 = vst.msk [vmem:[%s3912_s5 + $0x270] sm:$0xff] %vm1179_vm3, %v1719_v44  ;;  %v1711_v47 = vadd.f32 %v3216_v46, %v1710_v45 }
 0x233   :  { %v2522_v48 = vpop.f32.mrf.mxu1 }
 0x234   :  { %1993 = vst.msk [vmem:[%s3912_s5 + $0x260] sm:$0xff] %vm1179_vm3, %v1711_v47  ;;  %v1722_v49 = vadd.f32 %v2522_v48, %v3216_v46 }
 0x235   :  { %v1713_v50 = vpop.f32.mrf.mxu1 }
 0x236   :  { %1996 = vst.msk [vmem:[%s3912_s5 + $0x278] sm:$0xff] %vm1179_vm3, %v1722_v49  ;;  %v1714_v51 = vadd.f32 %v3216_v46, %v1713_v50 }
 0x237   :  { %v2525_v52 = vpop.f32.mrf.mxu1 }
 0x238   :  { %1994 = vst.msk [vmem:[%s3912_s5 + $0x268] sm:$0xff] %vm1179_vm3, %v1714_v51  ;;  %v1735_v53 = vadd.f32 %v2525_v52, %v3216_v46 }
 0x239   :  { %v1726_v54 = vpop.f32.mrf.mxu1 }
 0x23a   :  { %1999 = vst.msk [vmem:[%s3912_s5 + $0x290] sm:$0xff] %vm1179_vm3, %v1735_v53  ;;  %v1727_v55 = vadd.f32 %v3216_v46, %v1726_v54 }
 0x23b   :  { %v2526_v56 = vpop.f32.mrf.mxu1 }
 0x23c   :  { %1997 = vst.msk [vmem:[%s3912_s5 + $0x280] sm:$0xff] %vm1179_vm3, %v1727_v55  ;;  %v1738_v57 = vadd.f32 %v2526_v56, %v3216_v46 }
 0x23d   :  { %v1729_v58 = vpop.f32.mrf.mxu1 }
 0x23e   :  { %2000 = vst.msk [vmem:[%s3912_s5 + $0x298] sm:$0xff] %vm1179_vm3, %v1738_v57  ;;  %v1730_v59 = vadd.f32 %v3216_v46, %v1729_v58 }
 0x23f   :  { %v2529_v60 = vpop.f32.mrf.mxu1 }
 0x240   :  { %1998 = vst.msk [vmem:[%s3912_s5 + $0x288] sm:$0xff] %vm1179_vm3, %v1730_v59  ;;  %v1751_v61 = vadd.f32 %v2529_v60, %v3216_v46 }
 0x241   :  { %v1742_v62 = vpop.f32.mrf.mxu1 }
 0x242   :  { %2003 = vst.msk [vmem:[%s3912_s5 + $0x2b0] sm:$0xff] %vm1179_vm3, %v1751_v61  ;;  %v1743_v63 = vadd.f32 %v3216_v46, %v1742_v62 }
 0x243   :  { %v2530_v0 = vpop.f32.mrf.mxu1 }
 0x244   :  { %2001 = vst.msk [vmem:[%s3912_s5 + $0x2a0] sm:$0xff] %vm1179_vm3, %v1743_v63  ;;  %v1754_v1 = vadd.f32 %v2530_v0, %v3216_v46 }
 0x245   :  { %v1745_v2 = vpop.f32.mrf.mxu1 }
 0x246   :  { %2004 = vst.msk [vmem:[%s3912_s5 + $0x2b8] sm:$0xff] %vm1179_vm3, %v1754_v1  ;;  %v1746_v3 = vadd.f32 %v3216_v46, %v1745_v2 }
 0x247   :  { %v2533_v4 = vpop.f32.mrf.mxu1 }
 0x248   :  { %2002 = vst.msk [vmem:[%s3912_s5 + $0x2a8] sm:$0xff] %vm1179_vm3, %v1746_v3  ;;  %v1767_v5 = vadd.f32 %v2533_v4, %v3216_v46 }
 0x249   :  { %v1758_v32 = vpop.f32.mrf.mxu1 }
 0x24a   :  { %2007 = vst.msk [vmem:[%s3912_s5 + $0x2d0] sm:$0xff] %vm1179_vm3, %v1767_v5  ;;  %v1759_v6 = vadd.f32 %v3216_v46, %v1758_v32 }
 0x24b   :  { %v2534_v7 = vpop.f32.mrf.mxu1 }
 0x24c   :  { %2005 = vst.msk [vmem:[%s3912_s5 + $0x2c0] sm:$0xff] %vm1179_vm3, %v1759_v6  ;;  %v1770_v8 = vadd.f32 %v2534_v7, %v3216_v46 }
 0x24d   :  { %v1761_v9 = vpop.f32.mrf.mxu1 }
 0x24e   :  { %2008 = vst.msk [vmem:[%s3912_s5 + $0x2d8] sm:$0xff] %vm1179_vm3, %v1770_v8  ;;  %v1762_v10 = vadd.f32 %v3216_v46, %v1761_v9 }
 0x24f   :  { %v2537_v11 = vpop.f32.mrf.mxu1 }
 0x250   :  { %2006 = vst.msk [vmem:[%s3912_s5 + $0x2c8] sm:$0xff] %vm1179_vm3, %v1762_v10  ;;  %v1783_v12 = vadd.f32 %v2537_v11, %v3216_v46 }
 0x251   :  { %v1774_v13 = vpop.f32.mrf.mxu1 }
 0x252   :  { %2011 = vst.msk [vmem:[%s3912_s5 + $0x2f0] sm:$0xff] %vm1179_vm3, %v1783_v12  ;;  %v1775_v14 = vadd.f32 %v3216_v46, %v1774_v13 }
 0x253   :  { %v2538_v15 = vpop.f32.mrf.mxu1 }
 0x254   :  { %2009 = vst.msk [vmem:[%s3912_s5 + $0x2e0] sm:$0xff] %vm1179_vm3, %v1775_v14  ;;  %v1786_v16 = vadd.f32 %v2538_v15, %v3216_v46 }
 0x255   :  { %v1777_v17 = vpop.f32.mrf.mxu1 }
 0x256   :  { %2012 = vst.msk [vmem:[%s3912_s5 + $0x2f8] sm:$0xff] %vm1179_vm3, %v1786_v16  ;;  %v1778_v18 = vadd.f32 %v3216_v46, %v1777_v17 }
 0x257   :  { %v2541_v19 = vpop.f32.mrf.mxu1 }
 0x258   :  { %2010 = vst.msk [vmem:[%s3912_s5 + $0x2e8] sm:$0xff] %vm1179_vm3, %v1778_v18  ;;  %v1799_v20 = vadd.f32 %v2541_v19, %v3216_v46 }
 0x259   :  { %v1790_v21 = vpop.f32.mrf.mxu1 }
 0x25a   :  { %2015 = vst.msk [vmem:[%s3912_s5 + $0x310] sm:$0xff] %vm1179_vm3, %v1799_v20  ;;  %v1791_v22 = vadd.f32 %v3216_v46, %v1790_v21 }
 0x25b   :  { %v2542_v23 = vpop.f32.mrf.mxu1 }
 0x25c   :  { %2013 = vst.msk [vmem:[%s3912_s5 + $0x300] sm:$0xff] %vm1179_vm3, %v1791_v22  ;;  %v1802_v24 = vadd.f32 %v2542_v23, %v3216_v46 }
 0x25d   :  { %v1793_v25 = vpop.f32.mrf.mxu1 }
 0x25e   :  { %2016 = vst.msk [vmem:[%s3912_s5 + $0x318] sm:$0xff] %vm1179_vm3, %v1802_v24  ;;  %v1794_v26 = vadd.f32 %v3216_v46, %v1793_v25 }
 0x25f   :  { %v2545_v27 = vpop.f32.mrf.mxu1 }
 0x260   :  { %2014 = vst.msk [vmem:[%s3912_s5 + $0x308] sm:$0xff] %vm1179_vm3, %v1794_v26  ;;  %v1815_v28 = vadd.f32 %v2545_v27, %v3216_v46 }
 0x261   :  { %v1806_v29 = vpop.f32.mrf.mxu1 }
 0x262   :  { %2019 = vst.msk [vmem:[%s3912_s5 + $0x330] sm:$0xff] %vm1179_vm3, %v1815_v28  ;;  %v1807_v30 = vadd.f32 %v3216_v46, %v1806_v29 }
 0x263   :  { %v2546_v31 = vpop.f32.mrf.mxu1 }
 0x264   :  { %2017 = vst.msk [vmem:[%s3912_s5 + $0x320] sm:$0xff] %vm1179_vm3, %v1807_v30  ;;  %v1818_v33 = vadd.f32 %v2546_v31, %v3216_v46 }
 0x265   :  { %v1809_v34 = vpop.f32.mrf.mxu1 }
 0x266   :  { %2020 = vst.msk [vmem:[%s3912_s5 + $0x338] sm:$0xff] %vm1179_vm3, %v1818_v33  ;;  %v1810_v35 = vadd.f32 %v3216_v46, %v1809_v34 }
 0x267   :  { %v2549_v37 = vpop.f32.mrf.mxu1 }
 0x268   :  { %2018 = vst.msk [vmem:[%s3912_s5 + $0x328] sm:$0xff] %vm1179_vm3, %v1810_v35  ;;  %v1831_v36 = vadd.f32 %v2549_v37, %v3216_v46 }
 0x269   :  { %v1822_v38 = vpop.f32.mrf.mxu1 }
 0x26a   :  { %2023 = vst.msk [vmem:[%s3912_s5 + $0x350] sm:$0xff] %vm1179_vm3, %v1831_v36  ;;  %v1823_v39 = vadd.f32 %v3216_v46, %v1822_v38 }
 0x26b   :  { %v2550_v40 = vpop.f32.mrf.mxu1 }
 0x26c   :  { %2021 = vst.msk [vmem:[%s3912_s5 + $0x340] sm:$0xff] %vm1179_vm3, %v1823_v39  ;;  %v1834_v41 = vadd.f32 %v2550_v40, %v3216_v46 }
 0x26d   :  { %v1825_v42 = vpop.f32.mrf.mxu1 }
 0x26e   :  { %2024 = vst.msk [vmem:[%s3912_s5 + $0x358] sm:$0xff] %vm1179_vm3, %v1834_v41  ;;  %v1826_v43 = vadd.f32 %v3216_v46, %v1825_v42 }
 0x26f   :  { %v2553_v44 = vpop.f32.mrf.mxu1 }
 0x270   :  { %2022 = vst.msk [vmem:[%s3912_s5 + $0x348] sm:$0xff] %vm1179_vm3, %v1826_v43  ;;  %v1847_v45 = vadd.f32 %v2553_v44, %v3216_v46 }
 0x271   :  { %v1838_v47 = vpop.f32.mrf.mxu1 }
 0x272   :  { %2027 = vst.msk [vmem:[%s3912_s5 + $0x370] sm:$0xff] %vm1179_vm3, %v1847_v45  ;;  %v1839_v48 = vadd.f32 %v3216_v46, %v1838_v47 }
 0x273   :  { %v2554_v49 = vpop.f32.mrf.mxu1 }
 0x274   :  { %2025 = vst.msk [vmem:[%s3912_s5 + $0x360] sm:$0xff] %vm1179_vm3, %v1839_v48  ;;  %v1850_v50 = vadd.f32 %v2554_v49, %v3216_v46 }
 0x275   :  { %v1841_v51 = vpop.f32.mrf.mxu1 }
 0x276   :  { %2028 = vst.msk [vmem:[%s3912_s5 + $0x378] sm:$0xff] %vm1179_vm3, %v1850_v50  ;;  %v1842_v52 = vadd.f32 %v3216_v46, %v1841_v51 }
 0x277   :  { %v2557_v53 = vpop.f32.mrf.mxu1 }
 0x278   :  { %2026 = vst.msk [vmem:[%s3912_s5 + $0x368] sm:$0xff] %vm1179_vm3, %v1842_v52  ;;  %v1863_v54 = vadd.f32 %v2557_v53, %v3216_v46 }
 0x279   :  { %v1854_v55 = vpop.f32.mrf.mxu1 }
 0x27a   :  { %2031 = vst.msk [vmem:[%s3912_s5 + $0x390] sm:$0xff] %vm1179_vm3, %v1863_v54  ;;  %v1855_v56 = vadd.f32 %v3216_v46, %v1854_v55 }
 0x27b   :  { %v2558_v57 = vpop.f32.mrf.mxu1 }
 0x27c   :  { %2029 = vst.msk [vmem:[%s3912_s5 + $0x380] sm:$0xff] %vm1179_vm3, %v1855_v56  ;;  %v1866_v58 = vadd.f32 %v2558_v57, %v3216_v46 }
 0x27d   :  { %v1857_v59 = vpop.f32.mrf.mxu1 }
 0x27e   :  { %2032 = vst.msk [vmem:[%s3912_s5 + $0x398] sm:$0xff] %vm1179_vm3, %v1866_v58  ;;  %v1858_v60 = vadd.f32 %v3216_v46, %v1857_v59 }
 0x27f   :  { %v2561_v61 = vpop.f32.mrf.mxu1 }
 0x280   :  { %2030 = vst.msk [vmem:[%s3912_s5 + $0x388] sm:$0xff] %vm1179_vm3, %v1858_v60  ;;  %v1879_v62 = vadd.f32 %v2561_v61, %v3216_v46 }
 0x281   :  { %v1870_v63 = vpop.f32.mrf.mxu1 }
 0x282   :  { %2035 = vst.msk [vmem:[%s3912_s5 + $0x3b0] sm:$0xff] %vm1179_vm3, %v1879_v62  ;;  %v1871_v0 = vadd.f32 %v3216_v46, %v1870_v63 }
 0x283   :  { %v2562_v1 = vpop.f32.mrf.mxu1 }
 0x284   :  { %2033 = vst.msk [vmem:[%s3912_s5 + $0x3a0] sm:$0xff] %vm1179_vm3, %v1871_v0  ;;  %v1882_v2 = vadd.f32 %v2562_v1, %v3216_v46 }
 0x285   :  { %v1873_v3 = vpop.f32.mrf.mxu1 }
 0x286   :  { %2036 = vst.msk [vmem:[%s3912_s5 + $0x3b8] sm:$0xff] %vm1179_vm3, %v1882_v2  ;;  %v1874_v4 = vadd.f32 %v3216_v46, %v1873_v3 }
 0x287   :  { %v2565_v5 = vpop.f32.mrf.mxu1 }
 0x288   :  { %2034 = vst.msk [vmem:[%s3912_s5 + $0x3a8] sm:$0xff] %vm1179_vm3, %v1874_v4  ;;  %v1895_v32 = vadd.f32 %v2565_v5, %v3216_v46 }
 0x289   :  { %v1886_v6 = vpop.f32.mrf.mxu1 }
 0x28a   :  { %2039 = vst.msk [vmem:[%s3912_s5 + $0x3d0] sm:$0xff] %vm1179_vm3, %v1895_v32  ;;  %v1887_v7 = vadd.f32 %v3216_v46, %v1886_v6 }
 0x28b   :  { %v2566_v8 = vpop.f32.mrf.mxu1 }
 0x28c   :  { %2037 = vst.msk [vmem:[%s3912_s5 + $0x3c0] sm:$0xff] %vm1179_vm3, %v1887_v7  ;;  %v1898_v9 = vadd.f32 %v2566_v8, %v3216_v46 }
 0x28d   :  { %v1889_v10 = vpop.f32.mrf.mxu1 }
 0x28e   :  { %2040 = vst.msk [vmem:[%s3912_s5 + $0x3d8] sm:$0xff] %vm1179_vm3, %v1898_v9  ;;  %v1890_v11 = vadd.f32 %v3216_v46, %v1889_v10 }
 0x28f   :  { %v2569_v12 = vpop.f32.mrf.mxu1 }
 0x290   :  { %2038 = vst.msk [vmem:[%s3912_s5 + $0x3c8] sm:$0xff] %vm1179_vm3, %v1890_v11  ;;  %v1911_v13 = vadd.f32 %v2569_v12, %v3216_v46 }
 0x291   :  { %v1902_v14 = vpop.f32.mrf.mxu1 }
 0x292   :  { %2043 = vst.msk [vmem:[%s3912_s5 + $0x3f0] sm:$0xff] %vm1179_vm3, %v1911_v13  ;;  %v1903_v15 = vadd.f32 %v3216_v46, %v1902_v14 }
 0x293   :  { %v2570_v16 = vpop.f32.mrf.mxu1 }
 0x294   :  { %2041 = vst.msk [vmem:[%s3912_s5 + $0x3e0] sm:$0xff] %vm1179_vm3, %v1903_v15  ;;  %v1914_v17 = vadd.f32 %v2570_v16, %v3216_v46 }
 0x295   :  { %v1905_v18 = vpop.f32.mrf.mxu1 }
 0x296   :  { %2044 = vst.msk [vmem:[%s3912_s5 + $0x3f8] sm:$0xff] %vm1179_vm3, %v1914_v17  ;;  %v1906_v19 = vadd.f32 %v3216_v46, %v1905_v18 }
 0x298   :  { %2042 = vst.msk [vmem:[%s3912_s5 + $0x3e8] sm:$0xff] %vm1179_vm3, %v1906_v19 }

</bundles_post_ra>
